<compile_context>
chip_gen: v7x
topology: tpu7x:2x2x1
jax: 0.10.0
libtpu: 0.0.40
codegen_flags: <defaults>
</compile_context>

<pallas_src>
import functools

import jax
import jax.numpy as jnp
from jax.experimental import pallas as pl
from jax.experimental.pallas import tpu as pltpu


# ------------------------------ Pallas kernel ------------------------------

def _fused_upconv_layer_kernel(x_ref, w1_ref, b1_ref, mask_ref, w2_ref, b2_ref,
                               o_ref, *, shifts, slack):
    """One batch element of  ConvTranspose2d(stride=2)(ReLU(Conv1x1(x))).

    Layout: channels on sublanes, halo-padded flattened spatial (L = Hp*Wp) on
    lanes, so matmuls and stores are lane-dense with real data.

    x_ref   : (Cin,   L)        bf16
    w1_ref  : (Cmid,  Cin)      bf16   1x1-conv weight
    b1_ref  : (Cmid,  1)        f32
    mask_ref: (1,     L)        f32    1 inside the image, 0 on the halo ring
    w2_ref  : (4*Cout, D*Cmid)  bf16   per-parity transposed-conv taps (zeros
                                       for shifts a parity does not use)
    b2_ref  : (4*Cout, 1)       f32
    o_ref   : (4*Cout, L)       bf16 / f32   all 4 output parities (padded pos.)
    """
    # Conv1x1 + bias + ReLU (f32 accumulation on the MXU); halo forced to zero.
    y1 = jnp.dot(w1_ref[...], x_ref[...], preferred_element_type=jnp.float32)
    y1 = jnp.maximum(y1 + b1_ref[...], 0.0) * mask_ref[...]
    y1 = y1.astype(jnp.bfloat16)                                # (Cmid, L)

    # Build the D distinct spatially shifted copies of y1 with static lane
    # slices of a slack-padded buffer, stacked along the sublane axis.
    cmid, length = y1.shape
    z = jnp.zeros((cmid, slack), jnp.bfloat16)
    ybig = jnp.concatenate([z, y1, z], axis=1)                  # (Cmid, L + 2*slack)
    cols = jnp.concatenate(
        [ybig[:, slack - s:slack - s + length] for s in shifts],
        axis=0)                                                 # (D*Cmid, L)

    # All four output parities of the stride-2 transposed conv in one GEMM.
    out = jnp.dot(w2_ref[...], cols, preferred_element_type=jnp.float32)
    out = out + b2_ref[...]
    o_ref[...] = out.astype(o_ref.dtype)


def _fused_upconv_layer(xp, w1f, b1f, mask, w2m, b2m, *, shifts, slack,
                        out_dtype, true_hw, taps_per_parity):
    """pallas_call wrapper for one fused layer.  xp: (N, Cin, Hp*Wp) bf16."""
    n, cin, length = xp.shape
    cmid = w1f.shape[0]
    c4, dk = w2m.shape
    cout = c4 // 4
    h, w = true_hw

    cost = pl.CostEstimate(
        flops=2 * n * h * w * cin * cmid
              + 2 * n * 4 * h * w * cout * taps_per_parity * cmid,
        transcendentals=0,
        bytes_accessed=int(xp.size * 2 + w1f.size * 2 + w2m.size * 2
                           + (b1f.size + b2m.size + mask.size) * 4
                           + n * c4 * length * jnp.dtype(out_dtype).itemsize),
    )

    kern = functools.partial(_fused_upconv_layer_kernel,
                             shifts=shifts, slack=slack)
    return pl.pallas_call(
        kern,
        out_shape=jax.ShapeDtypeStruct((n, c4, length), out_dtype),
        grid_spec=pltpu.PrefetchScalarGridSpec(
            num_scalar_prefetch=0,
            grid=(n,),                      # one image per step; parallel -> 2 TCs
            in_specs=[
                pl.BlockSpec((None, cin, length), lambda i: (i, 0, 0)),
                pl.BlockSpec((cmid, cin), lambda i: (0, 0)),
                pl.BlockSpec((cmid, 1), lambda i: (0, 0)),
                pl.BlockSpec((1, length), lambda i: (0, 0)),
                pl.BlockSpec((c4, dk), lambda i: (0, 0)),
                pl.BlockSpec((c4, 1), lambda i: (0, 0)),
            ],
            out_specs=pl.BlockSpec((None, c4, length), lambda i: (i, 0, 0)),
        ),
        compiler_params=pltpu.CompilerParams(
            dimension_semantics=("parallel",),
            vmem_limit_bytes=32 * 1024 * 1024,
        ),
        cost_estimate=cost,
    )(xp, w1f, b1f, mask, w2m, b2m)


# --------------------------- layer preparation (tiny) ---------------------------

def _transposed_conv_geometry(K, pad):
    """Output-parity tap sets of ConvTranspose2d(K, stride=2, padding=pad).

    Every UpConvBlock configuration satisfies K - 2*pad - 2 == 0, so the output
    of an (H, W) input is exactly (2H, 2W) and
        out[2q+r, 2s+t, c] = bd[c] + sum_{taps (dh,dw,kh,kw) of parity (r,t), ci}
                             y[q-dh, s-dw, ci] * wd[ci, c, kh, kw]   (zero outside).
    """
    assert K % 2 == 0 and K - 2 * pad - 2 == 0, (K, pad)
    taps = []
    for r in range(2):
        for t in range(2):
            g = []
            for kh in range(K):
                if (kh - r - pad) % 2:
                    continue
                for kw in range(K):
                    if (kw - t - pad) % 2:
                        continue
                    g.append(((kh - r - pad) // 2, (kw - t - pad) // 2, kh, kw))
            taps.append(g)                                     # g index = 2*r + t
    halo = max(max(abs(dh), abs(dw)) for g in taps for (dh, dw, _, _) in g)
    return taps, max(halo, 1)


def _pack_layer_weights(w1, b1, wd, bd, taps, Wp):
    """Pack one layer's weights into the kernel's GEMM layout (all tiny)."""
    cmid = w1.shape[0]
    cout = wd.shape[1]
    shifts = tuple(sorted({dh * Wp + dw for g in taps for (dh, dw, _, _) in g}))
    sidx = {s: i for i, s in enumerate(shifts)}
    num_shifts = len(shifts)

    w1f = w1[:, :, 0, 0].astype(jnp.bfloat16)                   # (Cmid, Cin)
    b1f = b1.reshape(cmid, 1).astype(jnp.float32)

    w2m = jnp.zeros((4 * cout, num_shifts * cmid), jnp.float32)
    for g, g_taps in enumerate(taps):
        for dh, dw, kh, kw in g_taps:
            d = sidx[dh * Wp + dw]
            w2m = w2m.at[g * cout:(g + 1) * cout,
                         d * cmid:(d + 1) * cmid].set(wd[:, :, kh, kw].T)
    w2m = w2m.astype(jnp.bfloat16)
    b2m = jnp.tile(bd.reshape(1, cout), (4, 1)).reshape(4 * cout, 1)
    return w1f, b1f, w2m, b2m.astype(jnp.float32), shifts


# --------------------------------- forward ---------------------------------

def upconv_block_forward(x_nchw, weights, meta):
    """UpConvBlock.forward.  x: (N, C, H, W).  weights[i] = (w1, b1, wd, bd),
    meta[i] = (kernel_size, padding) of layer i (static)."""
    x = x_nchw
    n_layers = len(weights)
    for li, ((w1, b1, wd, bd), (K, pad)) in enumerate(zip(weights, meta)):
        N, Cin, H, W = x.shape
        cout = wd.shape[1]
        taps, halo = _transposed_conv_geometry(K, pad)
        Hp, Wp = H + 2 * halo, W + 2 * halo
        L = Hp * Wp

        w1f, b1f, w2m, b2m, shifts = _pack_layer_weights(w1, b1, wd, bd, taps, Wp)
        mask = jnp.pad(jnp.ones((H, W), jnp.float32),
                       ((halo, halo), (halo, halo))).reshape(1, L)
        xp = jnp.pad(x.astype(jnp.bfloat16),
                     ((0, 0), (0, 0), (halo, halo), (halo, halo))).reshape(N, Cin, L)

        out_dtype = jnp.float32 if li == n_layers - 1 else jnp.bfloat16
        y = _fused_upconv_layer(xp, w1f, b1f, mask, w2m, b2m,
                                shifts=shifts, slack=halo * (Wp + 1),
                                out_dtype=out_dtype, true_hw=(H, W),
                                taps_per_parity=len(taps[0]))
        # (N, 4*Cout, Hp*Wp): drop the halo and interleave the 4 output parities.
        y = y.reshape(N, 2, 2, cout, Hp, Wp)[:, :, :, :, halo:halo + H,
                                             halo:halo + W]
        x = jnp.transpose(y, (0, 3, 4, 1, 5, 2)).reshape(N, cout, 2 * H, 2 * W)
    return x


# --------------------------------- reference ---------------------------------

def _reference(x, weights, meta):
    y = x
    for (w1, b1, wd, bd), (K, pad) in zip(weights, meta):
        y = jax.lax.conv_general_dilated(
            y, w1, (1, 1), ((0, 0), (0, 0)),
            dimension_numbers=('NCHW', 'OIHW', 'NCHW')) + b1.reshape(1, -1, 1, 1)
        y = jnp.maximum(y, 0.0)
        rhs = jnp.transpose(jnp.flip(wd, (2, 3)), (1, 0, 2, 3))   # (Cout,Cin,K,K)
        q = K - 1 - pad
        y = jax.lax.conv_general_dilated(
            y, rhs, window_strides=(1, 1), padding=((q, q), (q, q)),
            lhs_dilation=(2, 2),
            dimension_numbers=('NCHW', 'OIHW', 'NCHW')) + bd.reshape(1, -1, 1, 1)
    return y


# ----------------------------------- main -----------------------------------

if __name__ == "__main__":
    key = jax.random.PRNGKey(0)

    up_scale = 2
    constant_features = 16
    all_pads = [0, 0, 1, 3, 7]

    N, Cin, H, W = 2, 4, 16, 16
    keys = list(jax.random.split(key, 1 + 4 * up_scale))
    x = jax.random.normal(keys[0], (N, Cin, H, W), jnp.float32)

    weights, meta = [], []
    in_f, ki = Cin, 1
    for i in range(up_scale):
        K = 2 ** up_scale
        pad = all_pads[up_scale]
        out_f = 1 if i == up_scale - 1 else constant_features
        w1 = 0.25 * jax.random.normal(keys[ki], (out_f, in_f, 1, 1), jnp.float32)
        b1 = 0.10 * jax.random.normal(keys[ki + 1], (out_f,), jnp.float32)
        wd = 0.25 * jax.random.normal(keys[ki + 2], (out_f, out_f, K, K), jnp.float32)
        bd = 0.10 * jax.random.normal(keys[ki + 3], (out_f,), jnp.float32)
        weights.append((w1, b1, wd, bd))
        meta.append((K, pad))
        in_f = out_f
        ki += 4

    forward = jax.jit(functools.partial(upconv_block_forward, meta=tuple(meta)))
    out = jax.block_until_ready(forward(x, weights))
    ref = _reference(x, weights, meta)

    expect_shape = (N, 1, H * 2 ** up_scale, W * 2 ** up_scale)
    assert out.shape == ref.shape == expect_shape, (out.shape, ref.shape)
    max_err = float(jnp.max(jnp.abs(out - ref)))
    assert jnp.allclose(out, ref, atol=5e-2, rtol=5e-2), max_err

    print("KERNEL_OK")
</pallas_src>

<mosaic_0001>
module attributes {stable_mosaic.version = 11 : i64} {
  func.func @_fused_upconv_layer_kernel(%arg0: i32, %arg1: memref<1x4x324xbf16, #tpu.memory_space<vmem>>, %arg2: memref<16x4xbf16, #tpu.memory_space<vmem>>, %arg3: memref<16x1xf32, #tpu.memory_space<vmem>>, %arg4: memref<1x324xf32, #tpu.memory_space<vmem>>, %arg5: memref<64x144xbf16, #tpu.memory_space<vmem>>, %arg6: memref<64x1xf32, #tpu.memory_space<vmem>>, %arg7: memref<1x64x324xbf16, #tpu.memory_space<vmem>>) attributes {dimension_semantics = [#tpu.dimension_semantics<parallel>], iteration_bounds = array<i64: 2>, scalar_prefetch = 0 : i64, scratch_operands = 0 : i64, tpu.core_type = #tpu.core_type<tc>, window_params = [{transform_indices = @transform_0, window_bounds = array<i64: 1, 4, 324>}, {pipeline_mode = #tpu.pipeline_mode<synchronous>, transform_indices = @transform_1, window_bounds = array<i64: 16, 4>}, {pipeline_mode = #tpu.pipeline_mode<synchronous>, transform_indices = @transform_2, window_bounds = array<i64: 16, 1>}, {pipeline_mode = #tpu.pipeline_mode<synchronous>, transform_indices = @transform_3, window_bounds = array<i64: 1, 324>}, {pipeline_mode = #tpu.pipeline_mode<synchronous>, transform_indices = @transform_4, window_bounds = array<i64: 64, 144>}, {pipeline_mode = #tpu.pipeline_mode<synchronous>, transform_indices = @transform_5, window_bounds = array<i64: 64, 1>}, {transform_indices = @transform_6, window_bounds = array<i64: 1, 64, 324>}]} {
    %c0 = arith.constant 0 : index
    %c0_0 = arith.constant 0 : index
    %0 = vector.load %arg2[%c0, %c0_0] : memref<16x4xbf16, #tpu.memory_space<vmem>>, vector<16x4xbf16>
    %c0_1 = arith.constant 0 : index
    %c0_2 = arith.constant 0 : index
    %c0_3 = arith.constant 0 : index
    %1 = vector.load %arg1[%c0_1, %c0_2, %c0_3] : memref<1x4x324xbf16, #tpu.memory_space<vmem>>, vector<1x4x324xbf16>
    %2 = vector.shape_cast %1 : vector<1x4x324xbf16> to vector<4x324xbf16>
    %cst = arith.constant dense<0.000000e+00> : vector<16x324xf32>
    %3 = tpu.matmul %0, %2, %cst {dimension_numbers = #tpu.dot_dimension_numbers<[1], [0], [0], [1], [0, 0, 1, 1], [], []>} : vector<16x4xbf16>, vector<4x324xbf16>, vector<16x324xf32> -> vector<16x324xf32>
    %c0_4 = arith.constant 0 : index
    %c0_5 = arith.constant 0 : index
    %4 = vector.load %arg3[%c0_4, %c0_5] : memref<16x1xf32, #tpu.memory_space<vmem>>, vector<16x1xf32>
    %5 = vector.broadcast %4 : vector<16x1xf32> to vector<16x324xf32>
    %6 = arith.addf %3, %5 : vector<16x324xf32>
    %cst_6 = arith.constant 0.000000e+00 : f32
    %7 = vector.broadcast %cst_6 : f32 to vector<16x324xf32>
    %8 = arith.maximumf %6, %7 : vector<16x324xf32>
    %c0_7 = arith.constant 0 : index
    %c0_8 = arith.constant 0 : index
    %9 = vector.load %arg4[%c0_7, %c0_8] : memref<1x324xf32, #tpu.memory_space<vmem>>, vector<1x324xf32>
    %10 = vector.broadcast %9 : vector<1x324xf32> to vector<16x324xf32>
    %11 = arith.mulf %8, %10 : vector<16x324xf32>
    %12 = arith.truncf %11 : vector<16x324xf32> to vector<16x324xbf16>
    %cst_9 = arith.constant 0.000000e+00 : bf16
    %13 = vector.broadcast %cst_9 : bf16 to vector<16x19xbf16>
    %14 = tpu.concatenate %13, %12, %13 in 1 : vector<16x19xbf16>, vector<16x324xbf16>, vector<16x19xbf16> -> vector<16x362xbf16>
    %15 = vector.extract_strided_slice %14 {offsets = [0, 38], sizes = [16, 324], strides = [1, 1]} : vector<16x362xbf16> to vector<16x324xbf16>
    %16 = vector.extract_strided_slice %14 {offsets = [0, 37], sizes = [16, 324], strides = [1, 1]} : vector<16x362xbf16> to vector<16x324xbf16>
    %17 = vector.extract_strided_slice %14 {offsets = [0, 36], sizes = [16, 324], strides = [1, 1]} : vector<16x362xbf16> to vector<16x324xbf16>
    %18 = vector.extract_strided_slice %14 {offsets = [0, 20], sizes = [16, 324], strides = [1, 1]} : vector<16x362xbf16> to vector<16x324xbf16>
    %19 = vector.extract_strided_slice %14 {offsets = [0, 19], sizes = [16, 324], strides = [1, 1]} : vector<16x362xbf16> to vector<16x324xbf16>
    %20 = vector.extract_strided_slice %14 {offsets = [0, 18], sizes = [16, 324], strides = [1, 1]} : vector<16x362xbf16> to vector<16x324xbf16>
    %21 = vector.extract_strided_slice %14 {offsets = [0, 2], sizes = [16, 324], strides = [1, 1]} : vector<16x362xbf16> to vector<16x324xbf16>
    %22 = vector.extract_strided_slice %14 {offsets = [0, 1], sizes = [16, 324], strides = [1, 1]} : vector<16x362xbf16> to vector<16x324xbf16>
    %23 = vector.extract_strided_slice %14 {offsets = [0, 0], sizes = [16, 324], strides = [1, 1]} : vector<16x362xbf16> to vector<16x324xbf16>
    %24 = tpu.concatenate %15, %16, %17, %18, %19, %20, %21, %22, %23 in 0 : vector<16x324xbf16>, vector<16x324xbf16>, vector<16x324xbf16>, vector<16x324xbf16>, vector<16x324xbf16>, vector<16x324xbf16>, vector<16x324xbf16>, vector<16x324xbf16>, vector<16x324xbf16> -> vector<144x324xbf16>
    %c0_10 = arith.constant 0 : index
    %c0_11 = arith.constant 0 : index
    %25 = vector.load %arg5[%c0_10, %c0_11] : memref<64x144xbf16, #tpu.memory_space<vmem>>, vector<64x144xbf16>
    %cst_12 = arith.constant dense<0.000000e+00> : vector<64x324xf32>
    %26 = tpu.matmul %25, %24, %cst_12 {dimension_numbers = #tpu.dot_dimension_numbers<[1], [0], [0], [1], [0, 0, 1, 1], [], []>} : vector<64x144xbf16>, vector<144x324xbf16>, vector<64x324xf32> -> vector<64x324xf32>
    %c0_13 = arith.constant 0 : index
    %c0_14 = arith.constant 0 : index
    %27 = vector.load %arg6[%c0_13, %c0_14] : memref<64x1xf32, #tpu.memory_space<vmem>>, vector<64x1xf32>
    %28 = vector.broadcast %27 : vector<64x1xf32> to vector<64x324xf32>
    %29 = arith.addf %26, %28 : vector<64x324xf32>
    %30 = arith.truncf %29 : vector<64x324xf32> to vector<64x324xbf16>
    %c0_15 = arith.constant 0 : index
    %c0_16 = arith.constant 0 : index
    %c0_17 = arith.constant 0 : index
    %31 = vector.load %arg7[%c0_15, %c0_16, %c0_17] : memref<1x64x324xbf16, #tpu.memory_space<vmem>>, vector<1x64x324xbf16>
    %32 = vector.shape_cast %31 : vector<1x64x324xbf16> to vector<64x324xbf16>
    %33 = vector.shape_cast %30 : vector<64x324xbf16> to vector<1x64x324xbf16>
    tpu.vector_store %arg7[%c0_15, %c0_16, %c0_17], %33 {strides = array<i32>} : memref<1x64x324xbf16, #tpu.memory_space<vmem>>, vector<1x64x324xbf16>,
    return
  }
  func.func @transform_0(%arg0: i32) -> (i32, i32, i32) {
    %c0_i32 = arith.constant 0 : i32
    %c0_i32_0 = arith.constant 0 : i32
    %c0_i32_1 = arith.constant 0 : i32
    return %arg0, %c0_i32, %c0_i32_0 : i32, i32, i32
  }
  func.func @transform_1(%arg0: i32) -> (i32, i32) {
    %c0_i32 = arith.constant 0 : i32
    %c0_i32_0 = arith.constant 0 : i32
    %c0_i32_1 = arith.constant 0 : i32
    return %c0_i32, %c0_i32_0 : i32, i32
  }
  func.func @transform_2(%arg0: i32) -> (i32, i32) {
    %c0_i32 = arith.constant 0 : i32
    %c0_i32_0 = arith.constant 0 : i32
    %c0_i32_1 = arith.constant 0 : i32
    return %c0_i32, %c0_i32_0 : i32, i32
  }
  func.func @transform_3(%arg0: i32) -> (i32, i32) {
    %c0_i32 = arith.constant 0 : i32
    %c0_i32_0 = arith.constant 0 : i32
    %c0_i32_1 = arith.constant 0 : i32
    return %c0_i32, %c0_i32_0 : i32, i32
  }
  func.func @transform_4(%arg0: i32) -> (i32, i32) {
    %c0_i32 = arith.constant 0 : i32
    %c0_i32_0 = arith.constant 0 : i32
    %c0_i32_1 = arith.constant 0 : i32
    return %c0_i32, %c0_i32_0 : i32, i32
  }
  func.func @transform_5(%arg0: i32) -> (i32, i32) {
    %c0_i32 = arith.constant 0 : i32
    %c0_i32_0 = arith.constant 0 : i32
    %c0_i32_1 = arith.constant 0 : i32
    return %c0_i32, %c0_i32_0 : i32, i32
  }
  func.func @transform_6(%arg0: i32) -> (i32, i32, i32) {
    %c0_i32 = arith.constant 0 : i32
    %c0_i32_0 = arith.constant 0 : i32
    %c0_i32_1 = arith.constant 0 : i32
    return %arg0, %c0_i32, %c0_i32_0 : i32, i32, i32
  }
}

module attributes {stable_mosaic.version = 11 : i64} {
  func.func @_fused_upconv_layer_kernel(%arg0: i32, %arg1: memref<1x16x1156xbf16, #tpu.memory_space<vmem>>, %arg2: memref<1x16xbf16, #tpu.memory_space<vmem>>, %arg3: memref<1x1xf32, #tpu.memory_space<vmem>>, %arg4: memref<1x1156xf32, #tpu.memory_space<vmem>>, %arg5: memref<4x9xbf16, #tpu.memory_space<vmem>>, %arg6: memref<4x1xf32, #tpu.memory_space<vmem>>, %arg7: memref<1x4x1156xf32, #tpu.memory_space<vmem>>) attributes {dimension_semantics = [#tpu.dimension_semantics<parallel>], iteration_bounds = array<i64: 2>, scalar_prefetch = 0 : i64, scratch_operands = 0 : i64, tpu.core_type = #tpu.core_type<tc>, window_params = [{transform_indices = @transform_0, window_bounds = array<i64: 1, 16, 1156>}, {pipeline_mode = #tpu.pipeline_mode<synchronous>, transform_indices = @transform_1, window_bounds = array<i64: 1, 16>}, {pipeline_mode = #tpu.pipeline_mode<synchronous>, transform_indices = @transform_2, window_bounds = array<i64: 1, 1>}, {pipeline_mode = #tpu.pipeline_mode<synchronous>, transform_indices = @transform_3, window_bounds = array<i64: 1, 1156>}, {pipeline_mode = #tpu.pipeline_mode<synchronous>, transform_indices = @transform_4, window_bounds = array<i64: 4, 9>}, {pipeline_mode = #tpu.pipeline_mode<synchronous>, transform_indices = @transform_5, window_bounds = array<i64: 4, 1>}, {transform_indices = @transform_6, window_bounds = array<i64: 1, 4, 1156>}]} {
    %c0 = arith.constant 0 : index
    %c0_0 = arith.constant 0 : index
    %0 = vector.load %arg2[%c0, %c0_0] : memref<1x16xbf16, #tpu.memory_space<vmem>>, vector<1x16xbf16>
    %c0_1 = arith.constant 0 : index
    %c0_2 = arith.constant 0 : index
    %c0_3 = arith.constant 0 : index
    %1 = vector.load %arg1[%c0_1, %c0_2, %c0_3] : memref<1x16x1156xbf16, #tpu.memory_space<vmem>>, vector<1x16x1156xbf16>
    %2 = vector.shape_cast %1 : vector<1x16x1156xbf16> to vector<16x1156xbf16>
    %cst = arith.constant dense<0.000000e+00> : vector<1x1156xf32>
    %3 = tpu.matmul %0, %2, %cst {dimension_numbers = #tpu.dot_dimension_numbers<[1], [0], [0], [1], [0, 0, 1, 1], [], []>} : vector<1x16xbf16>, vector<16x1156xbf16>, vector<1x1156xf32> -> vector<1x1156xf32>
    %c0_4 = arith.constant 0 : index
    %c0_5 = arith.constant 0 : index
    %4 = vector.load %arg3[%c0_4, %c0_5] : memref<1x1xf32, #tpu.memory_space<vmem>>, vector<1x1xf32>
    %5 = vector.broadcast %4 : vector<1x1xf32> to vector<1x1156xf32>
    %6 = arith.addf %3, %5 : vector<1x1156xf32>
    %cst_6 = arith.constant 0.000000e+00 : f32
    %7 = vector.broadcast %cst_6 : f32 to vector<1x1156xf32>
    %8 = arith.maximumf %6, %7 : vector<1x1156xf32>
    %c0_7 = arith.constant 0 : index
    %c0_8 = arith.constant 0 : index
    %9 = vector.load %arg4[%c0_7, %c0_8] : memref<1x1156xf32, #tpu.memory_space<vmem>>, vector<1x1156xf32>
    %10 = arith.mulf %8, %9 : vector<1x1156xf32>
    %11 = arith.truncf %10 : vector<1x1156xf32> to vector<1x1156xbf16>
    %cst_9 = arith.constant 0.000000e+00 : bf16
    %12 = vector.broadcast %cst_9 : bf16 to vector<1x35xbf16>
    %13 = tpu.concatenate %12, %11, %12 in 1 : vector<1x35xbf16>, vector<1x1156xbf16>, vector<1x35xbf16> -> vector<1x1226xbf16>
    %14 = vector.extract_strided_slice %13 {offsets = [0, 70], sizes = [1, 1156], strides = [1, 1]} : vector<1x1226xbf16> to vector<1x1156xbf16>
    %15 = vector.extract_strided_slice %13 {offsets = [0, 69], sizes = [1, 1156], strides = [1, 1]} : vector<1x1226xbf16> to vector<1x1156xbf16>
    %16 = vector.extract_strided_slice %13 {offsets = [0, 68], sizes = [1, 1156], strides = [1, 1]} : vector<1x1226xbf16> to vector<1x1156xbf16>
    %17 = vector.extract_strided_slice %13 {offsets = [0, 36], sizes = [1, 1156], strides = [1, 1]} : vector<1x1226xbf16> to vector<1x1156xbf16>
    %18 = vector.extract_strided_slice %13 {offsets = [0, 35], sizes = [1, 1156], strides = [1, 1]} : vector<1x1226xbf16> to vector<1x1156xbf16>
    %19 = vector.extract_strided_slice %13 {offsets = [0, 34], sizes = [1, 1156], strides = [1, 1]} : vector<1x1226xbf16> to vector<1x1156xbf16>
    %20 = vector.extract_strided_slice %13 {offsets = [0, 2], sizes = [1, 1156], strides = [1, 1]} : vector<1x1226xbf16> to vector<1x1156xbf16>
    %21 = vector.extract_strided_slice %13 {offsets = [0, 1], sizes = [1, 1156], strides = [1, 1]} : vector<1x1226xbf16> to vector<1x1156xbf16>
    %22 = vector.extract_strided_slice %13 {offsets = [0, 0], sizes = [1, 1156], strides = [1, 1]} : vector<1x1226xbf16> to vector<1x1156xbf16>
    %23 = tpu.concatenate %14, %15, %16, %17, %18, %19, %20, %21, %22 in 0 : vector<1x1156xbf16>, vector<1x1156xbf16>, vector<1x1156xbf16>, vector<1x1156xbf16>, vector<1x1156xbf16>, vector<1x1156xbf16>, vector<1x1156xbf16>, vector<1x1156xbf16>, vector<1x1156xbf16> -> vector<9x1156xbf16>
    %c0_10 = arith.constant 0 : index
    %c0_11 = arith.constant 0 : index
    %24 = vector.load %arg5[%c0_10, %c0_11] : memref<4x9xbf16, #tpu.memory_space<vmem>>, vector<4x9xbf16>
    %cst_12 = arith.constant dense<0.000000e+00> : vector<4x1156xf32>
    %25 = tpu.matmul %24, %23, %cst_12 {dimension_numbers = #tpu.dot_dimension_numbers<[1], [0], [0], [1], [0, 0, 1, 1], [], []>} : vector<4x9xbf16>, vector<9x1156xbf16>, vector<4x1156xf32> -> vector<4x1156xf32>
    %c0_13 = arith.constant 0 : index
    %c0_14 = arith.constant 0 : index
    %26 = vector.load %arg6[%c0_13, %c0_14] : memref<4x1xf32, #tpu.memory_space<vmem>>, vector<4x1xf32>
    %27 = vector.broadcast %26 : vector<4x1xf32> to vector<4x1156xf32>
    %28 = arith.addf %25, %27 : vector<4x1156xf32>
    %c0_15 = arith.constant 0 : index
    %c0_16 = arith.constant 0 : index
    %c0_17 = arith.constant 0 : index
    %29 = vector.load %arg7[%c0_15, %c0_16, %c0_17] : memref<1x4x1156xf32, #tpu.memory_space<vmem>>, vector<1x4x1156xf32>
    %30 = vector.shape_cast %29 : vector<1x4x1156xf32> to vector<4x1156xf32>
    %31 = vector.shape_cast %28 : vector<4x1156xf32> to vector<1x4x1156xf32>
    tpu.vector_store %arg7[%c0_15, %c0_16, %c0_17], %31 {strides = array<i32>} : memref<1x4x1156xf32, #tpu.memory_space<vmem>>, vector<1x4x1156xf32>,
    return
  }
  func.func @transform_0(%arg0: i32) -> (i32, i32, i32) {
    %c0_i32 = arith.constant 0 : i32
    %c0_i32_0 = arith.constant 0 : i32
    %c0_i32_1 = arith.constant 0 : i32
    return %arg0, %c0_i32, %c0_i32_0 : i32, i32, i32
  }
  func.func @transform_1(%arg0: i32) -> (i32, i32) {
    %c0_i32 = arith.constant 0 : i32
    %c0_i32_0 = arith.constant 0 : i32
    %c0_i32_1 = arith.constant 0 : i32
    return %c0_i32, %c0_i32_0 : i32, i32
  }
  func.func @transform_2(%arg0: i32) -> (i32, i32) {
    %c0_i32 = arith.constant 0 : i32
    %c0_i32_0 = arith.constant 0 : i32
    %c0_i32_1 = arith.constant 0 : i32
    return %c0_i32, %c0_i32_0 : i32, i32
  }
  func.func @transform_3(%arg0: i32) -> (i32, i32) {
    %c0_i32 = arith.constant 0 : i32
    %c0_i32_0 = arith.constant 0 : i32
    %c0_i32_1 = arith.constant 0 : i32
    return %c0_i32, %c0_i32_0 : i32, i32
  }
  func.func @transform_4(%arg0: i32) -> (i32, i32) {
    %c0_i32 = arith.constant 0 : i32
    %c0_i32_0 = arith.constant 0 : i32
    %c0_i32_1 = arith.constant 0 : i32
    return %c0_i32, %c0_i32_0 : i32, i32
  }
  func.func @transform_5(%arg0: i32) -> (i32, i32) {
    %c0_i32 = arith.constant 0 : i32
    %c0_i32_0 = arith.constant 0 : i32
    %c0_i32_1 = arith.constant 0 : i32
    return %c0_i32, %c0_i32_0 : i32, i32
  }
  func.func @transform_6(%arg0: i32) -> (i32, i32, i32) {
    %c0_i32 = arith.constant 0 : i32
    %c0_i32_0 = arith.constant 0 : i32
    %c0_i32_1 = arith.constant 0 : i32
    return %arg0, %c0_i32, %c0_i32_0 : i32, i32, i32
  }
}

</mosaic_0001>

<bundles_post_ra>
// kernel: tile.10
= control target key start
LH: loop header
LB: loop body
LE: loop exit
PB: predicated region body
PF: predicated region fallthrough
CT: control target
= control target key end

     0   :  { %2 = vsyncpa [#allocation1], 0  ;;  %s44_s6 = smov [#allocation0]   ;;  %s70_s0 = inlined_call_operand.hbm [shape: f32[16], index: 0, kind: input, shape index: {}]   ;;  %s71_s1 = inlined_call_operand.vmem [shape: f32[4,1,1,16], index: 1, kind: output, shape index: {}]  }
   0x1   :  { %s9_s7 = sshll.u32 %s44_s6, 4  ;;  %s20_s10 = scalar_lea.hbm %s70_s0, 16  ;;  %s10_s7 = int_to_ptr.vmem [resolvable:$true] %s9_s7 }
   0x2   :  { %p21_p0 = scmp.ne.s32.totalorder %s70_s0, %s20_s10  ;;  %p24_p1 = scmp.lt.u32.totalorder %s20_s10, %s70_s0 }
   0x4   :  { %p26_p2 = pnand %p24_p1, %p21_p0 }
   0x6   :  { %29 = shalt.err (!%p26_p2)
}
   0x7   :  { %s30_s15 = scalar_lea.vmem %s10_s7, 16  ;;  %s34_s16 = scalar_lea.vmem %s10_s7, 32 }
   0x8   :  { %p31_p3 = scmp.ne.s32.totalorder %s10_s7, %s30_s15  ;;  %p35_p4 = scmp.lt.s32.totalorder %s10_s7, %s10_s7 }
   0x9   :  { %p36_p5 = scmp.lt.s32.totalorder %s34_s16, %s30_s15 }
   0xb   :  { %p37_p6 = por %p36_p5, %p35_p4 }
   0xd   :  { %p38_p7 = pnand %p37_p6, %p31_p3 }
   0xf   :  { %41 = shalt.err (!%p38_p7)
}
  0x10   :  { %12 = dma.hbm_to_vmem [thread:$0]  %s70_s0, 16, %s10_s7, [#allocation1]  }
  0x11   :  { %42 = dma.done.wait [#allocation1], 16  }
  0x12   :  { %43 = vsyncadd [#allocation1], 4294967280  ;;  %v16_v0 = vld [vmem:[#allocation0] ss:$0 sm:$0xff] }
  0x13   :  { %17 = vst [vmem:[%s71_s1] sm:$0xf] %v16_v0 }
  0x14   :  { %18 = vsyncpa [#allocation1], 1 }

// kernel: tile.0
= control target key start
LH: loop header
LB: loop body
LE: loop exit
PB: predicated region body
PF: predicated region fallthrough
CT: control target
= control target key end

     0   :  { %s176_s8 = smov 125   ;;  %s177_s9 = smov 126   ;;  %vm7_vm0 = vcmask 7168   ;;  %s331_s0 = inlined_call_operand.vmem [shape: f32[4,1,1,16], index: 0, kind: input, shape index: {}]   ;;  %s332_s1 = inlined_call_operand.vmem [shape: f32[64,1], index: 1, kind: output, shape index: {}]  }
   0x1   :  { %v4_v0 = vld [vmem:[%s331_s0] sm:$0xf]  ;;  %s175_s0 = smov 127   ;;  %s178_s10 = smov 124  }
   0x2   :  { %5 = vst [vmem:[#allocation0] sm:$0xf] %v4_v0  ;;  %s179_s11 = smov 123   ;;  %s180_s12 = smov 122  }
   0x3   :  { %s181_s13 = smov 121   ;;  %s182_s14 = smov 120  }
   0x4   :  { %s183_s19 = smov 119   ;;  %s184_s20 = smov 118  }
   0x5   :  { %s185_s21 = smov 117   ;;  %s186_s22 = smov 116  }
   0x6   :  { %s187_s23 = smov 115   ;;  %s188_s24 = smov 114  }
   0x7   :  { %s189_s25 = smov 113  }
   0x9   :  { %v10_v1 = vld [vmem:[#allocation0] sm:$0xf]  }
   0xa   :  { %v26_v2 = vld [vmem:[#allocation0] sm:$0xf]   ;;  %11 = vrot.lane.b32.xlu0 %v10_v1, %s175_s0 }
   0xb   :  { %27 = vrot.lane.b32.xlu1 %v26_v2, %s176_s8  ;;  %v18_v3 = vld [vmem:[#allocation0] sm:$0xf]  }
   0xc   :  { %v34_v4 = vld [vmem:[#allocation0] sm:$0xf]  }
   0xd   :  { %v42_v5 = vld [vmem:[#allocation0] sm:$0xf]  }
   0xe   :  { %19 = vrot.lane.b32.xlu0 %v18_v3, %s177_s9  ;;  %v50_v6 = vld [vmem:[#allocation0] sm:$0xf]  }
   0xf   :  { %35 = vrot.lane.b32.xlu1 %v34_v4, %s178_s10  ;;  %v58_v7 = vld [vmem:[#allocation0] sm:$0xf]  }
  0x10   :  { %v66_v8 = vld [vmem:[#allocation0] sm:$0xf]  }
  0x11   :  { %v74_v9 = vld [vmem:[#allocation0] sm:$0xf]  }
  0x12   :  { %43 = vrot.lane.b32.xlu0 %v42_v5, %s179_s11  ;;  %v82_v10 = vld [vmem:[#allocation0] sm:$0xf]  }
  0x13   :  { %51 = vrot.lane.b32.xlu1 %v50_v6, %s180_s12  ;;  %v6_v11 = vld [vmem:[#allocation0] sm:$0xf]  }
  0x14   :  { %8 = vst.msk [vmem:[%s332_s1] ss:$16 sm:$0x3] %vm7_vm0, %v6_v11   ;;  %9 = vst.msk [vmem:[%s332_s1] ss:$16 sm:$0xc] %vm7_vm0, %v6_v11  }
  0x15   :  { %v90_v12 = vld [vmem:[#allocation0] sm:$0xf]  }
  0x16   :  { %59 = vrot.lane.b32.xlu0 %v58_v7, %s181_s13  ;;  %v98_v13 = vld [vmem:[#allocation0] sm:$0xf]  }
  0x17   :  { %67 = vrot.lane.b32.xlu1 %v66_v8, %s182_s14  ;;  %v106_v14 = vld [vmem:[#allocation0] sm:$0xf]  }
  0x18   :  { %v114_v15 = vld [vmem:[#allocation0] sm:$0xf]  }
  0x19   :  { %v122_v16 = vld [vmem:[#allocation0] sm:$0xf]  }
  0x1a   :  { %75 = vrot.lane.b32.xlu0 %v74_v9, %s183_s19 }
  0x1b   :  { %83 = vrot.lane.b32.xlu1 %v82_v10, %s184_s20 }
  0x1e   :  { %91 = vrot.lane.b32.xlu0 %v90_v12, %s185_s21 }
  0x1f   :  { %99 = vrot.lane.b32.xlu1 %v98_v13, %s186_s22 }
  0x22   :  { %107 = vrot.lane.b32.xlu0 %v106_v14, %s187_s23 }
  0x23   :  { %115 = vrot.lane.b32.xlu1 %v114_v15, %s188_s24 }
  0x26   :  { %123 = vrot.lane.b32.xlu0 %v122_v16, %s189_s25 }
  0x7c   :  { %v12_v17 = vpop.permute.xlu0 %11  }
  0x7d   :  { %v28_v18 = vpop.permute.xlu1 %27   ;;  %130 = vst.msk [vmem:[%s332_s1 + $0x1] ss:$16 sm:$0x3] %vm7_vm0, %v12_v17   ;;  %131 = vst.msk [vmem:[%s332_s1 + $0x1] ss:$16 sm:$0xc] %vm7_vm0, %v12_v17  }
  0x7e   :  { %134 = vst.msk [vmem:[%s332_s1 + $0x3] ss:$16 sm:$0x3] %vm7_vm0, %v28_v18   ;;  %135 = vst.msk [vmem:[%s332_s1 + $0x3] ss:$16 sm:$0xc] %vm7_vm0, %v28_v18  }
  0x80   :  { %v20_v19 = vpop.permute.xlu0 %19  }
  0x81   :  { %v36_v20 = vpop.permute.xlu1 %35   ;;  %132 = vst.msk [vmem:[%s332_s1 + $0x2] ss:$16 sm:$0x3] %vm7_vm0, %v20_v19   ;;  %133 = vst.msk [vmem:[%s332_s1 + $0x2] ss:$16 sm:$0xc] %vm7_vm0, %v20_v19  }
  0x82   :  { %136 = vst.msk [vmem:[%s332_s1 + $0x4] ss:$16 sm:$0x3] %vm7_vm0, %v36_v20   ;;  %137 = vst.msk [vmem:[%s332_s1 + $0x4] ss:$16 sm:$0xc] %vm7_vm0, %v36_v20  }
  0x84   :  { %v44_v21 = vpop.permute.xlu0 %43  }
  0x85   :  { %v52_v22 = vpop.permute.xlu1 %51   ;;  %138 = vst.msk [vmem:[%s332_s1 + $0x5] ss:$16 sm:$0x3] %vm7_vm0, %v44_v21   ;;  %139 = vst.msk [vmem:[%s332_s1 + $0x5] ss:$16 sm:$0xc] %vm7_vm0, %v44_v21  }
  0x86   :  { %140 = vst.msk [vmem:[%s332_s1 + $0x6] ss:$16 sm:$0x3] %vm7_vm0, %v52_v22   ;;  %141 = vst.msk [vmem:[%s332_s1 + $0x6] ss:$16 sm:$0xc] %vm7_vm0, %v52_v22  }
  0x88   :  { %v60_v23 = vpop.permute.xlu0 %59  }
  0x89   :  { %v68_v24 = vpop.permute.xlu1 %67   ;;  %142 = vst.msk [vmem:[%s332_s1 + $0x7] ss:$16 sm:$0x3] %vm7_vm0, %v60_v23   ;;  %143 = vst.msk [vmem:[%s332_s1 + $0x7] ss:$16 sm:$0xc] %vm7_vm0, %v60_v23  }
  0x8a   :  { %144 = vst.msk [vmem:[%s332_s1 + $0x8] ss:$16 sm:$0x3] %vm7_vm0, %v68_v24   ;;  %145 = vst.msk [vmem:[%s332_s1 + $0x8] ss:$16 sm:$0xc] %vm7_vm0, %v68_v24  }
  0x8c   :  { %v76_v25 = vpop.permute.xlu0 %75  }
  0x8d   :  { %v84_v26 = vpop.permute.xlu1 %83   ;;  %146 = vst.msk [vmem:[%s332_s1 + $0x9] ss:$16 sm:$0x3] %vm7_vm0, %v76_v25   ;;  %147 = vst.msk [vmem:[%s332_s1 + $0x9] ss:$16 sm:$0xc] %vm7_vm0, %v76_v25  }
  0x8e   :  { %148 = vst.msk [vmem:[%s332_s1 + $0xa] ss:$16 sm:$0x3] %vm7_vm0, %v84_v26   ;;  %149 = vst.msk [vmem:[%s332_s1 + $0xa] ss:$16 sm:$0xc] %vm7_vm0, %v84_v26  }
  0x90   :  { %v92_v27 = vpop.permute.xlu0 %91  }
  0x91   :  { %v100_v28 = vpop.permute.xlu1 %99   ;;  %150 = vst.msk [vmem:[%s332_s1 + $0xb] ss:$16 sm:$0x3] %vm7_vm0, %v92_v27   ;;  %151 = vst.msk [vmem:[%s332_s1 + $0xb] ss:$16 sm:$0xc] %vm7_vm0, %v92_v27  }
  0x92   :  { %152 = vst.msk [vmem:[%s332_s1 + $0xc] ss:$16 sm:$0x3] %vm7_vm0, %v100_v28   ;;  %153 = vst.msk [vmem:[%s332_s1 + $0xc] ss:$16 sm:$0xc] %vm7_vm0, %v100_v28  }
  0x94   :  { %v108_v29 = vpop.permute.xlu0 %107  }
  0x95   :  { %v116_v30 = vpop.permute.xlu1 %115   ;;  %154 = vst.msk [vmem:[%s332_s1 + $0xd] ss:$16 sm:$0x3] %vm7_vm0, %v108_v29   ;;  %155 = vst.msk [vmem:[%s332_s1 + $0xd] ss:$16 sm:$0xc] %vm7_vm0, %v108_v29  }
  0x96   :  { %156 = vst.msk [vmem:[%s332_s1 + $0xe] ss:$16 sm:$0x3] %vm7_vm0, %v116_v30   ;;  %157 = vst.msk [vmem:[%s332_s1 + $0xe] ss:$16 sm:$0xc] %vm7_vm0, %v116_v30  }
  0x98   :  { %v124_v31 = vpop.permute.xlu0 %123  }
  0x99   :  { %158 = vst.msk [vmem:[%s332_s1 + $0xf] ss:$16 sm:$0x3] %vm7_vm0, %v124_v31   ;;  %159 = vst.msk [vmem:[%s332_s1 + $0xf] ss:$16 sm:$0xc] %vm7_vm0, %v124_v31  }

// kernel: upconv_block_forward.2
= control target key start
LH: loop header
LB: loop body
LE: loop exit
PB: predicated region body
PF: predicated region fallthrough
CT: control target
= control target key end

     0   :  { %s1171_s21 = smov 0   ;;  %s1364_s0 = inlined_call_operand.vmem [shape: bf16[2,4,324], index: 0, kind: input, shape index: {}]   ;;  %s1365_s1 = inlined_call_operand.vmem [shape: bf16[16,4], index: 1, kind: input, shape index: {}]   ;;  %s1366_s2 = inlined_call_operand.vmem [shape: f32[16,1], index: 2, kind: input, shape index: {}]   ;;  %s1367_s3 = inlined_call_operand.vmem [shape: f32[1,324], index: 3, kind: input, shape index: {}]   ;;  %s1368_s4 = inlined_call_operand.vmem [shape: bf16[64,144], index: 4, kind: input, shape index: {}]   ;;  %s1369_s5 = inlined_call_operand.vmem [shape: f32[64,1], index: 5, kind: input, shape index: {}]   ;;  %s1370_s6 = inlined_call_operand.vmem [shape: bf16[2,64,324], index: 6, kind: output, shape index: {}]  }
   0x1 LB: > { %s1007_s22 = sadd.s32 4294967295, %s1121_s21   ;;  %p1011_p0 = scmp.ge.s32.totalorder %s1121_s21, 1  ;;  %s1121_s21 = sphi %s1171_s21, %s16_s21  }
   0x2   : > { %p212_p1 = scmp.lt.s32.totalorder %s1121_s21, 3 }
   0x4   : > { %p213_p2 = pnand %p1011_p0, %p212_p1 }
   0x5   : > { %p242_p3 = scmp.lt.s32.totalorder (!%p213_p2), %s1007_s22, 1  ;;  %v278_v0 = vlaneseq (!%p213_p2)  ;;  %v1123_v1 = vmov (!%p213_p2), 1983009808   ;;  %v1124_v3 = vmov (!%p213_p2), 0.0   ;;  %v1125_v5 = vmov (!%p213_p2), 0   ;;  %v256_v6 = vld [vmem:[%s1366_s2] sm:$0xff] (!%p213_p2) }
   0x6   : > { %216 = sbr.rel (%p213_p2) target bundleno = 892 (0x37c), region = 44  ;;  %v276_v2 = vunpack.c.l.s4 (!%p213_p2), %v1123_v1  ;;  %1070 = vmatprep.subr.bf16.mxu1 (!%p213_p2), %v1124_v3  ;;  %336 = vmatprep.mubr.bf16.mxu0 (!%p213_p2), %v1125_v5  ;;  %vm1126_vm0 = vmmov (!%p213_p2), 0   ;;  %v257_v9 = vld [vmem:[%s1366_s2 + $0x8] sm:$0xff] (!%p213_p2)  ;;  %vm294_vm1 = vcmask (!%p213_p2), 1041408   ;;  %v1102_v17 = vld [vmem:[%s1365_s1] sm:$0xff] (!%p213_p2)   ;;  %vm290_vm2 = vcmask (!%p213_p2), 31744  }
   0x7   : > { %v279_v4 = vshrl.u32 (!%p213_p2), %v278_v0, 7  ;;  %1072 = vmatprep.mubr.msk.bf16.mxu1 (!%p213_p2), %vm1126_vm0, %v1124_v3  ;;  %1099 = vset.pattern.permute.xlu0 (!%p213_p2), %v1125_v5  ;;  %v394_v22 = vld [vmem:[%s1367_s3] sm:$0x7] (!%p213_p2)  ;;  %s1127_s11 = smov (!%p213_p2), 19   ;;  %vm429_vm3 = vcmask (!%p213_p2), 154624   ;;  %s1128_s12 = smov (!%p213_p2), 2  }
   0x8   : > { %v277_v7 = vunpack.c.0.s8 (!%p213_p2), %v276_v2  ;;  %1100 = vset.pattern.permute.xlu1 (!%p213_p2), %v1125_v5  ;;  %260 = vperm.xlu0 (!%p213_p2), %1099, %v256_v6   ;;  %s1129_s13 = smov (!%p213_p2), 1   ;;  %s1130_s14 = smov (!%p213_p2), 18   ;;  %vm436_vm4 = vcmask (!%p213_p2), 711680   ;;  %vm447_vm5 = vcmask (!%p213_p2), 7168   ;;  %vm456_vm6 = vcmask (!%p213_p2), 15360  }
   0x9   : > { %v398_v19 = vsub.s32 (!%p213_p2), 0, %v279_v4  ;;  %v406_v20 = vsub.s32 (!%p213_p2), 2, %v279_v4  ;;  %v402_v25 = vsub.s32 (!%p213_p2), 1, %v279_v4  ;;  %s1131_s15 = smov (!%p213_p2), 20   ;;  %s1132_s16 = smov (!%p213_p2), 36   ;;  %vm465_vm7 = vcmask (!%p213_p2), 146432  }
   0xa   : > { %v280_v8 = vsub.s32 (!%p213_p2), %v277_v7, %v279_v4  ;;  %s1133_s17 = smov (!%p213_p2), 37   ;;  %s1134_s18 = smov (!%p213_p2), 38   ;;  %vm482_vm8 = vcmask (!%p213_p2), 162816   ;;  %vm491_vm9 = vcmask (!%p213_p2), 293888   ;;  %vm500_vm10 = vcmask (!%p213_p2), 302080  }
   0xb   : > { %v399_v30 = vrot.slane (!%p213_p2), %v394_v22, %v398_v19  ;;  %v407_v31 = vrot.slane (!%p213_p2), %v394_v22, %v406_v20  ;;  %v403_v42 = vrot.slane (!%p213_p2), %v394_v22, %v402_v25  ;;  %s1135_s19 = smov (!%p213_p2), 90   ;;  %vm704_vm11 = vcmask (!%p213_p2), 130048  }
   0xc   : > { %265 = vperm.xlu0 (!%p213_p2), %1099, %v257_v9   ;;  %vm509_vm12 = vcmask (!%p213_p2), 310272   ;;  %vm658_vm13 = vcmask (!%p213_p2), 736256   ;;  %vm936_vm14 = vcmask (!%p213_p2), 551936  }
   0xd   : > { %s1372_s22 = smov (!%p242_p3, %s1007_s22), 1 }
   0xe   : > { %s1076_s25 = smul.u32 6, %s1372_s22 }
   0xf   : > { %s1077_s8 = smul.u32 96, %s1372_s22 }
  0x10   : > { %s246_s30 = scalar_lea.vmem %s1364_s0, %s1076_s25 }
  0x11   : > { %v255_v10 = vld [vmem:[%s246_s30] sm:$0x3f] }
  0x12   : > { %v281_v11 = vrot.slane %v255_v10, %v280_v8  ;;  %v274_v12 = vcombine.high %v255_v10, %v255_v10 }
  0x14   : > { %v289_v13 = vcombine.high %v281_v11, %v281_v11  ;;  %v296_v14 = vsel %vm294_vm1, %v281_v11, 0  ;;  %v288_v15 = vrot.slane %v274_v12, %v280_v8 }
  0x16   : > { %1015 = vmatprep.subr.msk.bf16.mxu0 %vm294_vm1, %v289_v13  ;;  %v302_v16 = vsel %vm294_vm1, %v288_v15, 0 }
  0x17   : > { %305 = vmatpush1.bf16.msra.mxu0 %v296_v14  ;;  %1071 = vmatpush3.bf16.msra.mxu1 %v302_v16 }
  0x18   : > { %790 = vmatprep.subr.bf16.mxu1 %v1125_v5 }
  0x1a   : > { %1016 = vmatmul.mubr.msk.bf16.vlgmr.msra.gmra.mrb[0].mxu0 %vm290_vm2, %v1102_v17  ;;  %1073 = vmatmul.mubr.msk.bf16.vlgmr.msra.gmra.mrb[0].mxu1 %vm290_vm2, %v1102_v17 }
  0x87   : > { %v261_v18 = vpop.permute.xlu0 %260 }
  0x8b   : > { %v266_v21 = vpop.permute.xlu0 %265 }
  0xed   : > { %v338_v23 = vpop.f32.mrb[0].mxu0  ;;  %v381_v24 = vpop.f32.mrb[0].mxu1 }
  0xee   : > { %v339_v26 = vadd.f32 %v338_v23, %v261_v18  ;;  %v382_v27 = vadd.f32 %v381_v24, %v261_v18  ;;  %v340_v28 = vpop.f32.mrb[1].mxu0  ;;  %v1074_v29 = vpop.f32.mrb[1].mxu1 }
  0xef   : > { %v341_v32 = vadd.f32 %v340_v28, %v261_v18  ;;  %v342_v33 = vpop.f32.mrb[2].mxu0  ;;  %v384_v34 = vpop.f32.mrb[2].mxu1 }
  0xf0   : > { %v388_v35 = vmax.f32 %v339_v26, 0.0  ;;  %v390_v36 = vmax.f32 %v382_v27, 0.0  ;;  %v343_v37 = vadd.f32 %v342_v33, %v266_v21  ;;  %v385_v38 = vadd.f32 %v384_v34, %v266_v21  ;;  %v344_v39 = vpop.f32.mrb[3].mxu0  ;;  %v1075_v40 = vpop.f32.mrb[3].mxu1 }
  0xf1   : > { %v389_v41 = vmax.f32 %v341_v32, 0.0  ;;  %v345_v43 = vadd.f32 %v344_v39, %v266_v21  ;;  %v1103_v32 = vld [vmem:[%s1368_s4 + $0x4] ss:$8 sps:$4 sm:$0xff]  }
  0xf2   : > { %v391_v44 = vmax.f32 %v343_v37, 0.0  ;;  %v393_v45 = vmax.f32 %v385_v38, 0.0  ;;  %v411_v47 = vmul.f32 %v399_v30, %v388_v35  ;;  %v413_v48 = vmul.f32 %v407_v31, %v390_v36  ;;  %1030 = vmatprep.mubr.msk.bf16.mxu1 %vm704_vm11, %v1103_v32  ;;  %1026 = vmatprep.mubr.msk.bf16.mxu0 %vm704_vm11, %v1103_v32  ;;  %v1106_v32 = vld [vmem:[%s1368_s4 + $0x14] ss:$8 sps:$4 sm:$0xff]  }
  0xf3   : > { %v392_v46 = vmax.f32 %v345_v43, 0.0  ;;  %v412_v51 = vmul.f32 %v403_v42, %v389_v41 }
  0xf4   : > { %v414_v49 = vmul.f32 %v399_v30, %v391_v44  ;;  %v416_v50 = vmul.f32 %v407_v31, %v393_v45  ;;  %v520_v44 = vld [vmem:[%s1369_s5] sm:$0xff] }
  0xf5   : > { %v415_v52 = vmul.f32 %v403_v42, %v392_v46 }
  0xf6   : > { %v417_v53 = vpack.c.bf16 %v414_v49, %v411_v47  ;;  %v419_v54 = vpack.c.bf16 %v416_v50, %v413_v48  ;;  %v522_v47 = vld [vmem:[%s1369_s5 + $0x10] sm:$0xff]  ;;  %v524_v48 = vld [vmem:[%s1369_s5 + $0x20] sm:$0xff]  ;;  %v521_v50 = vld [vmem:[%s1369_s5 + $0x8] sm:$0xff] }
  0xf7   : > { %v418_v55 = vpack.c.bf16 %v415_v52, %v412_v51  ;;  %v526_v49 = vld [vmem:[%s1369_s5 + $0x30] sm:$0xff]  ;;  %v523_v51 = vld [vmem:[%s1369_s5 + $0x18] sm:$0xff]  ;;  %v525_v52 = vld [vmem:[%s1369_s5 + $0x28] sm:$0xff] }
  0xf8   : > { %423 = vrot.lane.b32.xlu0 %v417_v53, %s1127_s11  ;;  %v527_v53 = vld [vmem:[%s1369_s5 + $0x38] sm:$0xff] }
  0xf9   : > { %425 = vrot.lane.b32.xlu1 %v418_v55, %s1127_s11 }
  0xfd   : > { %427 = vrot.lane.b32.xlu1 %v419_v54, %s1127_s11 }
 0x16a   : > { %v424_v56 = vpop.permute.xlu0 %423 }
 0x16b   : > { %v435_v57 = vsel %vm429_vm3, 0, %v424_v56  ;;  %v426_v58 = vpop.permute.xlu1 %425 }
 0x16c   : > { %450 = vrot.lane.b32.xlu0 %v435_v57, %s1128_s12  ;;  %441 = vrot.lane.b32.xlu1 %v435_v57, %s1129_s13  ;;  %v430_v59 = vsel %vm429_vm3, %v424_v56, %v426_v58 }
 0x16f   : > { %v428_v60 = vpop.permute.xlu1 %427 }
 0x170   : > { %468 = vrot.lane.b32.xlu0 %v435_v57, %s1127_s11  ;;  %459 = vrot.lane.b32.xlu1 %v435_v57, %s1130_s14  ;;  %v431_v61 = vsel %vm429_vm3, %v426_v58, %v428_v60 }
 0x171   : > { %v438_v62 = vsel %vm436_vm4, %v431_v61, 0 }
 0x174   : > { %443 = vrot.lane.b32.xlu0 %v430_v59, %s1129_s13  ;;  %452 = vrot.lane.b32.xlu1 %v430_v59, %s1128_s12 }
 0x178   : > { %461 = vrot.lane.b32.xlu0 %v430_v59, %s1130_s14  ;;  %470 = vrot.lane.b32.xlu1 %v430_v59, %s1127_s11 }
 0x17c   : > { %478 = vrot.lane.b32.xlu0 %v430_v59, %s1131_s15  ;;  %445 = vrot.lane.b32.xlu1 %v438_v62, %s1129_s13 }
 0x180   : > { %454 = vrot.lane.b32.xlu0 %v438_v62, %s1128_s12  ;;  %476 = vrot.lane.b32.xlu1 %v435_v57, %s1131_s15 }
 0x184   : > { %485 = vrot.lane.b32.xlu0 %v435_v57, %s1132_s16  ;;  %463 = vrot.lane.b32.xlu1 %v438_v62, %s1130_s14 }
 0x188   : > { %472 = vrot.lane.b32.xlu0 %v438_v62, %s1127_s11  ;;  %487 = vrot.lane.b32.xlu1 %v430_v59, %s1132_s16  ;;  %s1335_s11 = scalar_lea.vmem %s1370_s6, %s1077_s8 }
 0x18c   : > { %496 = vrot.lane.b32.xlu0 %v430_v59, %s1133_s17  ;;  %480 = vrot.lane.b32.xlu1 %v438_v62, %s1131_s15 }
 0x190   : > { %489 = vrot.lane.b32.xlu0 %v438_v62, %s1132_s16  ;;  %494 = vrot.lane.b32.xlu1 %v435_v57, %s1133_s17 }
 0x194   : > { %503 = vrot.lane.b32.xlu0 %v435_v57, %s1134_s18  ;;  %498 = vrot.lane.b32.xlu1 %v438_v62, %s1133_s17 }
 0x198   : > { %507 = vrot.lane.b32.xlu0 %v438_v62, %s1134_s18  ;;  %505 = vrot.lane.b32.xlu1 %v430_v59, %s1134_s18 }
 0x19c   : > { %608 = vrot.lane.b32.xlu0 %v438_v62, %s1135_s19  ;;  %606 = vrot.lane.b32.xlu1 %v430_v59, %s1135_s19 }
 0x1a0   : > { %604 = vrot.lane.b32.xlu1 %v435_v57, %s1135_s19 }
 0x1de   : > { %v451_v63 = vpop.permute.xlu0 %450  ;;  %v442_v0 = vpop.permute.xlu1 %441 }
 0x1df   : > { %616 = vrot.lane.b32.xlu1 %v451_v63, %s1135_s19  ;;  %610 = vrot.lane.b32.xlu0 %v442_v0, %s1135_s19 }
 0x1e2   : > { %v469_v1 = vpop.permute.xlu0 %468  ;;  %v460_v2 = vpop.permute.xlu1 %459 }
 0x1e3   : > { %622 = vrot.lane.b32.xlu0 %v460_v2, %s1135_s19 }
 0x1e6   : > { %v444_v3 = vpop.permute.xlu0 %443  ;;  %v453_v4 = vpop.permute.xlu1 %452 }
 0x1e7   : > { %v448_v6 = vsel %vm447_vm5, %v442_v0, %v444_v3  ;;  %v457_v7 = vsel %vm456_vm6, %v451_v63, %v453_v4 }
 0x1e8   : > { %612 = vrot.lane.b32.xlu0 %v448_v6, %s1135_s19  ;;  %618 = vrot.lane.b32.xlu1 %v457_v7, %s1135_s19 }
 0x1ea   : > { %v462_v8 = vpop.permute.xlu0 %461  ;;  %v471_v9 = vpop.permute.xlu1 %470 }
 0x1eb   : > { %v466_v10 = vsel %vm465_vm7, %v460_v2, %v462_v8  ;;  %v474_v11 = vsel %vm429_vm3, %v469_v1, %v471_v9 }
 0x1ec   : > { %624 = vrot.lane.b32.xlu0 %v466_v10, %s1135_s19  ;;  %630 = vrot.lane.b32.xlu1 %v474_v11, %s1135_s19 }
 0x1ee   : > { %v479_v12 = vpop.permute.xlu0 %478  ;;  %v446_v13 = vpop.permute.xlu1 %445 }
 0x1ef   : > { %v449_v14 = vsel %vm447_vm5, %v444_v3, %v446_v13 }
 0x1f0   : > { %614 = vrot.lane.b32.xlu1 %v449_v14, %s1135_s19 }
 0x1f2   : > { %v455_v15 = vpop.permute.xlu0 %454  ;;  %v477_v16 = vpop.permute.xlu1 %476 }
 0x1f3   : > { %v483_v17 = vsel %vm482_vm8, %v477_v16, %v479_v12  ;;  %v458_v20 = vsel %vm456_vm6, %v453_v4, %v455_v15 }
 0x1f4   : > { %628 = vrot.lane.b32.xlu1 %v469_v1, %s1135_s19  ;;  %636 = vrot.lane.b32.xlu0 %v483_v17, %s1135_s19 }
 0x1f6   : > { %v486_v18 = vpop.permute.xlu0 %485  ;;  %v464_v19 = vpop.permute.xlu1 %463 }
 0x1f7   : > { %v467_v21 = vsel %vm465_vm7, %v462_v8, %v464_v19 }
 0x1f8   : > { %620 = vrot.lane.b32.xlu0 %v458_v20, %s1135_s19  ;;  %626 = vrot.lane.b32.xlu1 %v467_v21, %s1135_s19 }
 0x1fa   : > { %v473_v22 = vpop.permute.xlu0 %472  ;;  %v488_v23 = vpop.permute.xlu1 %487 }
 0x1fb   : > { %v492_v24 = vsel %vm491_vm9, %v486_v18, %v488_v23  ;;  %v475_v27 = vsel %vm429_vm3, %v471_v9, %v473_v22 }
 0x1fc   : > { %634 = vrot.lane.b32.xlu0 %v477_v16, %s1135_s19  ;;  %642 = vrot.lane.b32.xlu1 %v492_v24, %s1135_s19 }
 0x1fe   : > { %v497_v25 = vpop.permute.xlu0 %496  ;;  %v481_v26 = vpop.permute.xlu1 %480 }
 0x1ff   : > { %v484_v28 = vsel %vm482_vm8, %v479_v12, %v481_v26 }
 0x200   : > { %632 = vrot.lane.b32.xlu0 %v475_v27, %s1135_s19  ;;  %638 = vrot.lane.b32.xlu1 %v484_v28, %s1135_s19 }
 0x202   : > { %v490_v29 = vpop.permute.xlu0 %489  ;;  %v495_v30 = vpop.permute.xlu1 %494 }
 0x203   : > { %v501_v31 = vsel %vm500_vm10, %v495_v30, %v497_v25  ;;  %v493_v35 = vsel %vm491_vm9, %v488_v23, %v490_v29  ;;  %v1105_v29 = vld [vmem:[%s1368_s4] ss:$8 sps:$4 sm:$0xff]  }
 0x204   : > { %640 = vrot.lane.b32.xlu1 %v486_v18, %s1135_s19  ;;  %648 = vrot.lane.b32.xlu0 %v501_v31, %s1135_s19 }
 0x206   : > { %v504_v33 = vpop.permute.xlu0 %503  ;;  %v499_v34 = vpop.permute.xlu1 %498 }
 0x207   : > { %v502_v36 = vsel %vm500_vm10, %v497_v25, %v499_v34  ;;  %v1111_v34 = vld [vmem:[%s1368_s4 + $0x20] ss:$8 sps:$4 sm:$0xff]  }
 0x208   : > { %644 = vrot.lane.b32.xlu0 %v493_v35, %s1135_s19  ;;  %650 = vrot.lane.b32.xlu1 %v502_v36, %s1135_s19  ;;  %v1112_v35 = vld [vmem:[%s1368_s4 + $0x34] ss:$8 sps:$4 sm:$0xff]   ;;  %v1114_v36 = vld [vmem:[%s1368_s4 + $0x30] ss:$8 sps:$4 sm:$0xff]  }
 0x20a   : > { %v508_v37 = vpop.permute.xlu0 %507  ;;  %v506_v38 = vpop.permute.xlu1 %505 }
 0x20b   : > { %v510_v39 = vsel %vm509_vm12, %v504_v33, %v506_v38  ;;  %v511_v42 = vsel %vm509_vm12, %v506_v38, %v508_v37 }
 0x20c   : > { %646 = vrot.lane.b32.xlu0 %v495_v30, %s1135_s19  ;;  %654 = vrot.lane.b32.xlu1 %v510_v39, %s1135_s19 }
 0x20e   : > { %v609_v40 = vpop.permute.xlu0 %608  ;;  %v607_v41 = vpop.permute.xlu1 %606 }
 0x20f   : > { %791 = vmatpush1.bf16.msra.mxu1 %v609_v40  ;;  %v660_v43 = vsel %vm658_vm13, %v607_v41, %v609_v40 }
 0x210   : > { %656 = vrot.lane.b32.xlu0 %v511_v42, %s1135_s19  ;;  %652 = vrot.lane.b32.xlu1 %v504_v33, %s1135_s19  ;;  %v1109_v33 = vld [vmem:[%s1368_s4 + $0x24] ss:$8 sps:$4 sm:$0xff]  }
 0x211   : > { %717 = vmatprep.subr.bf16.mxu0 %v660_v43  ;;  %792 = vmatprep.subr.bf16.mxu1 %v1125_v5 }
 0x212   : > { %v605_v45 = vpop.permute.xlu1 %604 }
 0x213   : > { %v659_v46 = vsel %vm658_vm13, %v605_v45, %v607_v41 }
 0x214   : > { %530 = vperm.xlu0 %1099, %v520_v44   ;;  %718 = vmatpush1.bf16.msra.mxu0 %v659_v46 }
 0x215   : > { %535 = vperm.xlu1 %1100, %v521_v50  }
 0x218   : > { %540 = vperm.xlu0 %1099, %v522_v47  }
 0x219   : > { %545 = vperm.xlu1 %1100, %v523_v51  }
 0x21c   : > { %550 = vperm.xlu0 %1099, %v524_v48  }
 0x21d   : > { %555 = vperm.xlu1 %1100, %v525_v52  }
 0x220   : > { %560 = vperm.xlu0 %1099, %v526_v49  }
 0x221   : > { %565 = vperm.xlu1 %1100, %v527_v53  }
 0x251   : > { %v611_v54 = vpop.permute.xlu0 %610  ;;  %v617_v55 = vpop.permute.xlu1 %616 }
 0x255   : > { %v623_v56 = vpop.permute.xlu0 %622 }
 0x25a   : > { %v619_v57 = vpop.permute.xlu1 %618  ;;  %v613_v58 = vpop.permute.xlu0 %612 }
 0x25b   : > { %v661_v63 = vsel %vm658_vm13, %v611_v54, %v613_v58  ;;  %v663_v6 = vsel %vm658_vm13, %v617_v55, %v619_v57 }
 0x25e   : > { %v631_v59 = vpop.permute.xlu1 %630  ;;  %v625_v60 = vpop.permute.xlu0 %624 }
 0x25f   : > { %v665_v10 = vsel %vm658_vm13, %v623_v56, %v625_v60 }
 0x262   : > { %v615_v61 = vpop.permute.xlu1 %614 }
 0x263   : > { %793 = vmatpush1.bf16.msra.mxu1 %v615_v61  ;;  %v662_v62 = vsel %vm658_vm13, %v613_v58, %v615_v61 }
 0x264   : > { %719 = vmatprep.subr.bf16.mxu0 %v662_v62  ;;  %794 = vmatprep.subr.bf16.mxu1 %v1125_v5 }
 0x265   : > { %720 = vmatpush1.bf16.msra.mxu0 %v661_v63 }
 0x266   : > { %v637_v0 = vpop.permute.xlu0 %636  ;;  %v629_v1 = vpop.permute.xlu1 %628 }
 0x267   : > { %v667_v14 = vsel %vm658_vm13, %v629_v1, %v631_v59 }
 0x26a   : > { %v621_v2 = vpop.permute.xlu0 %620  ;;  %v627_v3 = vpop.permute.xlu1 %626 }
 0x26b   : > { %795 = vmatpush1.bf16.msra.mxu1 %v621_v2  ;;  %v664_v4 = vsel %vm658_vm13, %v619_v57, %v621_v2  ;;  %v666_v7 = vsel %vm658_vm13, %v625_v60, %v627_v3 }
 0x26c   : > { %721 = vmatprep.subr.bf16.mxu0 %v664_v4  ;;  %796 = vmatprep.subr.bf16.mxu1 %v1125_v5 }
 0x26d   : > { %722 = vmatpush1.bf16.msra.mxu0 %v663_v6 }
 0x26e   : > { %v635_v8 = vpop.permute.xlu0 %634  ;;  %723 = vmatprep.subr.bf16.mxu0 %v666_v7  ;;  %v643_v9 = vpop.permute.xlu1 %642 }
 0x26f   : > { %797 = vmatpush1.bf16.msra.mxu1 %v627_v3  ;;  %v669_v18 = vsel %vm658_vm13, %v635_v8, %v637_v0 }
 0x270   : > { %798 = vmatprep.subr.bf16.mxu1 %v1125_v5 }
 0x271   : > { %724 = vmatpush1.bf16.msra.mxu0 %v665_v10 }
 0x272   : > { %v633_v11 = vpop.permute.xlu0 %632  ;;  %v639_v12 = vpop.permute.xlu1 %638 }
 0x273   : > { %799 = vmatpush1.bf16.msra.mxu1 %v633_v11  ;;  %v668_v13 = vsel %vm658_vm13, %v631_v59, %v633_v11  ;;  %v670_v15 = vsel %vm658_vm13, %v637_v0, %v639_v12 }
 0x274   : > { %725 = vmatprep.subr.bf16.mxu0 %v668_v13  ;;  %800 = vmatprep.subr.bf16.mxu1 %v1125_v5 }
 0x275   : > { %726 = vmatpush1.bf16.msra.mxu0 %v667_v14 }
 0x276   : > { %v649_v16 = vpop.permute.xlu0 %648  ;;  %727 = vmatprep.subr.bf16.mxu0 %v670_v15  ;;  %v641_v17 = vpop.permute.xlu1 %640 }
 0x277   : > { %801 = vmatpush1.bf16.msra.mxu1 %v639_v12  ;;  %v671_v22 = vsel %vm658_vm13, %v641_v17, %v643_v9 }
 0x278   : > { %802 = vmatprep.subr.bf16.mxu1 %v1125_v5 }
 0x279   : > { %728 = vmatpush1.bf16.msra.mxu0 %v669_v18 }
 0x27a   : > { %v645_v19 = vpop.permute.xlu0 %644  ;;  %v651_v20 = vpop.permute.xlu1 %650 }
 0x27b   : > { %803 = vmatpush1.bf16.msra.mxu1 %v645_v19  ;;  %v672_v21 = vsel %vm658_vm13, %v643_v9, %v645_v19  ;;  %v674_v23 = vsel %vm658_vm13, %v649_v16, %v651_v20 }
 0x27c   : > { %729 = vmatprep.subr.bf16.mxu0 %v672_v21  ;;  %804 = vmatprep.subr.bf16.mxu1 %v1125_v5 }
 0x27d   : > { %730 = vmatpush1.bf16.msra.mxu0 %v671_v22 }
 0x27e   : > { %v647_v24 = vpop.permute.xlu0 %646  ;;  %731 = vmatprep.subr.bf16.mxu0 %v674_v23  ;;  %v655_v25 = vpop.permute.xlu1 %654 }
 0x27f   : > { %v673_v26 = vsel %vm658_vm13, %v647_v24, %v649_v16  ;;  %805 = vmatpush1.bf16.msra.mxu1 %v651_v20 }
 0x280   : > { %806 = vmatprep.subr.bf16.mxu1 %v1125_v5  ;;  %v1108_v5 = vld [vmem:[%s1368_s4 + $0x10] ss:$8 sps:$4 sm:$0xff]  }
 0x281   : > { %732 = vmatpush1.bf16.msra.mxu0 %v673_v26 }
 0x282   : > { %v657_v27 = vpop.permute.xlu0 %656  ;;  %v653_v28 = vpop.permute.xlu1 %652 }
 0x283   : > { %v675_v30 = vsel %vm658_vm13, %v653_v28, %v655_v25  ;;  %807 = vmatpush1.bf16.msra.mxu1 %v657_v27  ;;  %v676_v31 = vsel %vm658_vm13, %v655_v25, %v657_v27 }
 0x284   : > { %733 = vmatprep.subr.bf16.mxu0 %v676_v31 }
 0x285   : > { %734 = vmatpush1.bf16.msra.mxu0 %v675_v30 }
 0x286   : > { %823 = vmatmul.mubr.bf16.vlgmr.msra.gmra.mrb[4].mxu1 %v1105_v29 }
 0x287   : > { %1031 = vmatprep.mubr.msk.bf16.mxu1 %vm704_vm11, %v1106_v32 }
 0x288   : > { %750 = vmatmul.mubr.bf16.vlgmr.msra.gmra.mrb[4].mxu0 %v1105_v29 }
 0x289   : > { %1027 = vmatprep.mubr.msk.bf16.mxu0 %vm704_vm11, %v1106_v32 }
 0x28e   : > { %831 = vmatmul.mubr.bf16.gmra.mrb[8].mxu1 %v1108_v5 }
 0x28f   : > { %1032 = vmatprep.mubr.msk.bf16.mxu1 %vm704_vm11, %v1109_v33 }
 0x290   : > { %760 = vmatmul.mubr.bf16.gmra.mrb[8].mxu0 %v1108_v5 }
 0x291   : > { %1028 = vmatprep.mubr.msk.bf16.mxu0 %vm704_vm11, %v1109_v33 }
 0x293   : > { %v531_v37 = vpop.permute.xlu0 %530 }
 0x294   : > { %v536_v39 = vpop.permute.xlu1 %535 }
 0x296   : > { %839 = vmatmul.mubr.bf16.gmra.mrb[12].mxu1 %v1111_v34 }
 0x297   : > { %1033 = vmatprep.mubr.msk.bf16.mxu1 %vm704_vm11, %v1112_v35  ;;  %v541_v56 = vpop.permute.xlu0 %540 }
 0x298   : > { %770 = vmatmul.mubr.bf16.gmra.mrb[12].mxu0 %v1111_v34  ;;  %v546_v60 = vpop.permute.xlu1 %545 }
 0x299   : > { %1029 = vmatprep.mubr.msk.bf16.mxu0 %vm704_vm11, %v1112_v35 }
 0x29b   : > { %v551_v13 = vpop.permute.xlu0 %550 }
 0x29c   : > { %v556_v16 = vpop.permute.xlu1 %555 }
 0x29e   : > { %847 = vmatmul.mubr.bf16.gmra.mrb[16].mxu1 %v1114_v36 }
 0x29f   : > { %v561_v5 = vpop.permute.xlu0 %560 }
 0x2a0   : > { %780 = vmatmul.mubr.bf16.gmra.mrb[16].mxu0 %v1114_v36  ;;  %v566_v35 = vpop.permute.xlu1 %565 }
 0x359   : > { %v824_v38 = vpop.f32.mrb[4].mxu1 }
 0x35a   : > { %v825_v40 = vadd.f32 %v824_v38, %v531_v37  ;;  %v826_v41 = vpop.f32.mrb[5].mxu1 }
 0x35b   : > { %v751_v42 = vpop.f32.mrb[4].mxu0  ;;  %v827_v43 = vpop.f32.mrb[6].mxu1 }
 0x35c   : > { %v1053_v44 = vpack.c.bf16 %v825_v40, %v825_v40  ;;  %v752_v45 = vadd.f32 %v751_v42, %v531_v37  ;;  %v753_v46 = vpop.f32.mrb[5].mxu0  ;;  %v828_v47 = vadd.f32 %v827_v43, %v536_v39  ;;  %v829_v48 = vpop.f32.mrb[7].mxu1 }
 0x35d   : > { %v754_v49 = vadd.f32 %v753_v46, %v531_v37  ;;  %v755_v50 = vpop.f32.mrb[6].mxu0 }
 0x35e   : > { %937 = vst.msk [vmem:[%s1335_s11 + $0x8] sm:$0xf] %vm936_vm14, %v1053_v44  ;;  %v1055_v51 = vpack.c.bf16 %v828_v47, %v828_v47  ;;  %v756_v52 = vadd.f32 %v755_v50, %v536_v39  ;;  %v757_v53 = vpop.f32.mrb[7].mxu0 }
 0x35f   : > { %v1052_v54 = vpack.c.bf16 %v754_v49, %v752_v45  ;;  %v758_v55 = vadd.f32 %v757_v53, %v536_v39 }
 0x360   : > { %939 = vst.msk [vmem:[%s1335_s11 + $0x14] sm:$0xf] %vm936_vm14, %v1055_v51 }
 0x361   : > { %935 = vst [vmem:[%s1335_s11] sm:$0xff] %v1052_v54  ;;  %v1054_v57 = vpack.c.bf16 %v758_v55, %v756_v52  ;;  %v832_v58 = vpop.f32.mrb[8].mxu1 }
 0x362   : > { %v833_v59 = vadd.f32 %v832_v58, %v541_v56  ;;  %v834_v61 = vpop.f32.mrb[9].mxu1 }
 0x363   : > { %938 = vst [vmem:[%s1335_s11 + $0xc] sm:$0xff] %v1054_v57  ;;  %v761_v62 = vpop.f32.mrb[8].mxu0  ;;  %v835_v63 = vpop.f32.mrb[10].mxu1 }
 0x364   : > { %v1057_v0 = vpack.c.bf16 %v833_v59, %v833_v59  ;;  %v762_v1 = vadd.f32 %v761_v62, %v541_v56  ;;  %v836_v2 = vadd.f32 %v835_v63, %v546_v60  ;;  %v763_v3 = vpop.f32.mrb[9].mxu0  ;;  %v837_v4 = vpop.f32.mrb[11].mxu1 }
 0x365   : > { %v764_v6 = vadd.f32 %v763_v3, %v541_v56  ;;  %v765_v7 = vpop.f32.mrb[10].mxu0 }
 0x366   : > { %941 = vst.msk [vmem:[%s1335_s11 + $0x20] sm:$0xf] %vm936_vm14, %v1057_v0  ;;  %v1059_v8 = vpack.c.bf16 %v836_v2, %v836_v2  ;;  %v766_v9 = vadd.f32 %v765_v7, %v546_v60  ;;  %v767_v10 = vpop.f32.mrb[11].mxu0 }
 0x367   : > { %v1056_v11 = vpack.c.bf16 %v764_v6, %v762_v1  ;;  %v768_v12 = vadd.f32 %v767_v10, %v546_v60 }
 0x368   : > { %943 = vst.msk [vmem:[%s1335_s11 + $0x2c] sm:$0xf] %vm936_vm14, %v1059_v8 }
 0x369   : > { %940 = vst [vmem:[%s1335_s11 + $0x18] sm:$0xff] %v1056_v11  ;;  %v1058_v14 = vpack.c.bf16 %v768_v12, %v766_v9  ;;  %v840_v15 = vpop.f32.mrb[12].mxu1 }
 0x36a   : > { %v841_v17 = vadd.f32 %v840_v15, %v551_v13  ;;  %v842_v18 = vpop.f32.mrb[13].mxu1 }
 0x36b   : > { %942 = vst [vmem:[%s1335_s11 + $0x24] sm:$0xff] %v1058_v14  ;;  %v771_v19 = vpop.f32.mrb[12].mxu0  ;;  %v843_v20 = vpop.f32.mrb[14].mxu1 }
 0x36c   : > { %v1061_v21 = vpack.c.bf16 %v841_v17, %v841_v17  ;;  %v772_v22 = vadd.f32 %v771_v19, %v551_v13  ;;  %v844_v23 = vadd.f32 %v843_v20, %v556_v16  ;;  %v773_v24 = vpop.f32.mrb[13].mxu0  ;;  %v845_v25 = vpop.f32.mrb[15].mxu1 }
 0x36d   : > { %v774_v26 = vadd.f32 %v773_v24, %v551_v13  ;;  %v775_v27 = vpop.f32.mrb[14].mxu0 }
 0x36e   : > { %945 = vst.msk [vmem:[%s1335_s11 + $0x38] sm:$0xf] %vm936_vm14, %v1061_v21  ;;  %v1063_v28 = vpack.c.bf16 %v844_v23, %v844_v23  ;;  %v776_v29 = vadd.f32 %v775_v27, %v556_v16  ;;  %v777_v30 = vpop.f32.mrb[15].mxu0 }
 0x36f   : > { %v1060_v31 = vpack.c.bf16 %v774_v26, %v772_v22  ;;  %v778_v32 = vadd.f32 %v777_v30, %v556_v16 }
 0x370   : > { %947 = vst.msk [vmem:[%s1335_s11 + $0x44] sm:$0xf] %vm936_vm14, %v1063_v28 }
 0x371   : > { %944 = vst [vmem:[%s1335_s11 + $0x30] sm:$0xff] %v1060_v31  ;;  %v1062_v33 = vpack.c.bf16 %v778_v32, %v776_v29  ;;  %v848_v34 = vpop.f32.mrb[16].mxu1 }
 0x372   : > { %v849_v36 = vadd.f32 %v848_v34, %v561_v5  ;;  %v850_v37 = vpop.f32.mrb[17].mxu1 }
 0x373   : > { %946 = vst [vmem:[%s1335_s11 + $0x3c] sm:$0xff] %v1062_v33  ;;  %v781_v38 = vpop.f32.mrb[16].mxu0  ;;  %v851_v39 = vpop.f32.mrb[18].mxu1 }
 0x374   : > { %v1065_v40 = vpack.c.bf16 %v849_v36, %v849_v36  ;;  %v782_v41 = vadd.f32 %v781_v38, %v561_v5  ;;  %v852_v42 = vadd.f32 %v851_v39, %v566_v35  ;;  %v783_v43 = vpop.f32.mrb[17].mxu0  ;;  %v853_v44 = vpop.f32.mrb[19].mxu1 }
 0x375   : > { %v784_v45 = vadd.f32 %v783_v43, %v561_v5  ;;  %v785_v46 = vpop.f32.mrb[18].mxu0 }
 0x376   : > { %949 = vst.msk [vmem:[%s1335_s11 + $0x50] sm:$0xf] %vm936_vm14, %v1065_v40  ;;  %v1067_v47 = vpack.c.bf16 %v852_v42, %v852_v42  ;;  %v786_v48 = vadd.f32 %v785_v46, %v566_v35  ;;  %v787_v49 = vpop.f32.mrb[19].mxu0 }
 0x377   : > { %v1064_v50 = vpack.c.bf16 %v784_v45, %v782_v41  ;;  %v788_v51 = vadd.f32 %v787_v49, %v566_v35 }
 0x378   : > { %951 = vst.msk [vmem:[%s1335_s11 + $0x5c] sm:$0xf] %vm936_vm14, %v1067_v47 }
 0x379   : > { %948 = vst [vmem:[%s1335_s11 + $0x48] sm:$0xff] %v1064_v50  ;;  %v1066_v52 = vpack.c.bf16 %v788_v51, %v786_v48 }
 0x37b   : > { %950 = vst [vmem:[%s1335_s11 + $0x54] sm:$0xff] %v1066_v52 }
 0x37c PF: > { %s16_s21 = sadd.s32 1, %s1121_s21  }
 0x37d   : > { %p13_p4 = scmp.ge.s32.totalorder %s16_s21, 4  }
 0x37f   :  { %15 = sbr.rel (!%p13_p4) target bundleno = 1 (0x1), region = 74 }

// kernel: upconv_block_forward.3
= control target key start
LH: loop header
LB: loop body
LE: loop exit
PB: predicated region body
PF: predicated region fallthrough
CT: control target
= control target key end

     0   :  { %s1856_s23 = smov 0   ;;  %s2547_s0 = inlined_call_operand.vmem [shape: bf16[2,16,1156], index: 0, kind: input, shape index: {}]   ;;  %s2548_s1 = inlined_call_operand.vmem [shape: bf16[1,16], index: 1, kind: input, shape index: {}]   ;;  %s2549_s2 = inlined_call_operand.<no memory space> [shape: f32[1,1], index: 2, kind: input, shape index: {}]   ;;  %s2550_s3 = inlined_call_operand.vmem [shape: f32[1,1156], index: 3, kind: input, shape index: {}]   ;;  %s2551_s4 = inlined_call_operand.vmem [shape: bf16[4,9], index: 4, kind: input, shape index: {}]   ;;  %s2552_s5 = inlined_call_operand.vmem [shape: f32[4,1], index: 5, kind: input, shape index: {}]   ;;  %s2553_s6 = inlined_call_operand.vmem [shape: f32[2,4,1156], index: 6, kind: output, shape index: {}]  }
   0x1   :  { %v11_v0 = vstv %s2549_s2 }
   0x2   :  { %12 = vst [vmem:[#allocation2] sm:$0x1] %v11_v0 }
   0x3 LB: > { %s1632_s24 = sadd.s32 4294967295, %s1805_s23   ;;  %p1636_p0 = scmp.ge.s32.totalorder %s1805_s23, 1  ;;  %s1805_s23 = sphi %s1856_s23, %s18_s23  }
   0x4   : > { %p214_p1 = scmp.lt.s32.totalorder %s1805_s23, 3 }
   0x6   : > { %p215_p2 = pnand %p1636_p0, %p214_p1 }
   0x7   : > { %p244_p3 = scmp.lt.s32.totalorder (!%p215_p2), %s1632_s24, 1  ;;  %v1807_v1 = vmov (!%p215_p2), 0   ;;  %v255_v7 = vld [vmem:[%s2548_s1] sm:$0x1] (!%p215_p2)  ;;  %vm326_vm0 = vcmask (!%p215_p2), 130048   ;;  %v272_v14 = vlaneseq (!%p215_p2)  ;;  %s1808_s8 = smov (!%p215_p2), 35  }
   0x8   : > { %218 = sbr.rel (%p215_p2) target bundleno = 935 (0x3a7), region = 44  ;;  %362 = vmatprep.mubr.bf16.mxu0 (!%p215_p2), %v1807_v1  ;;  %403 = vmatprep.mubr.bf16.mxu1 (!%p215_p2), %v1807_v1  ;;  %v545_v20 = vld [vmem:[%s2550_s3] sm:$0xff] (!%p215_p2)  ;;  %vm649_vm1 = vcmask (!%p215_p2), 285696   ;;  %s1809_s11 = smov (!%p215_p2), 2   ;;  %vm672_vm2 = vcmask (!%p215_p2), 318464   ;;  %vm1055_vm3 = vcmask (!%p215_p2), 1040384  }
   0x9   : > { %v266_v2 = vld [vmem:[#allocation2] sm:$0x1] (!%p215_p2)  ;;  %1682 = vset.pattern.permute.xlu0 (!%p215_p2), %v1807_v1  ;;  %1783 = vset.pattern.permute.xlu1 (!%p215_p2), %v1807_v1  ;;  %v1887_v15 = vshrl.u32 (!%p215_p2), %v272_v14, 7  ;;  %v546_v14 = vld [vmem:[%s2550_s3 + $0x8] sm:$0x3] (!%p215_p2)  ;;  %s1810_s12 = smov (!%p215_p2), 70  }
   0xa   : > { %269 = vperm.xlu0 (!%p215_p2), %1682, %v266_v2   ;;  %s1811_s13 = smov (!%p215_p2), 68   ;;  %s1812_s14 = smov (!%p215_p2), 1   ;;  %vm1056_vm4 = vsmask.f32 (!%p215_p2), 256  ;;  %vm724_vm5 = vcmask (!%p215_p2), 7168   ;;  %vm2554_vm7 = vcmask (!%p215_p2), 15360  }
   0xb   : > { %v1890_v16 = vsub.s32 (!%p215_p2), 0, %v1887_v15  ;;  %v559_v19 = vsub.s32 (!%p215_p2), 2, %v1887_v15  ;;  %v555_v21 = vsub.s32 (!%p215_p2), 1, %v1887_v15  ;;  %v563_v22 = vsub.s32 (!%p215_p2), 3, %v1887_v15  ;;  %s1813_s15 = smov (!%p215_p2), 34   ;;  %s1814_s16 = smov (!%p215_p2), 36   ;;  %vm2138_vm6 = vmand (!%p215_p2), %vm1055_vm3, %vm1056_vm4 }
   0xc   : > { %v567_v44 = vsub.s32 (!%p215_p2), 4, %v1887_v15  ;;  %v575_v46 = vsub.s32 (!%p215_p2), 6, %v1887_v15  ;;  %v571_v47 = vsub.s32 (!%p215_p2), 5, %v1887_v15  ;;  %v579_v54 = vsub.s32 (!%p215_p2), 7, %v1887_v15  ;;  %s1815_s17 = smov (!%p215_p2), 69   ;;  %s1816_s18 = smov (!%p215_p2), 58  }
   0xd   : > { %v552_v26 = vrot.slane (!%p215_p2), %v545_v20, %v1890_v16  ;;  %v560_v30 = vrot.slane (!%p215_p2), %v545_v20, %v559_v19  ;;  %v556_v37 = vrot.slane (!%p215_p2), %v545_v20, %v555_v21  ;;  %v564_v38 = vrot.slane (!%p215_p2), %v545_v20, %v563_v22 }
   0xe   : > { %v568_v56 = vrot.slane (!%p215_p2), %v545_v20, %v567_v44  ;;  %v576_v60 = vrot.slane (!%p215_p2), %v545_v20, %v575_v46  ;;  %v572_v63 = vrot.slane (!%p215_p2), %v545_v20, %v571_v47  ;;  %vm1109_vm8 = vcmask (!%p215_p2), 1041408  }
   0xf   : > { %s2589_s24 = smov (!%p244_p3, %s1632_s24), 1  ;;  %vm1110_vm9 = vsmask.f32 1280  ;;  %vm816_vm10 = vcmask 277504   ;;  %vm955_vm11 = vcmask 556032   ;;  %vm905_vm13 = vcmask 293888  }
  0x10   : > { %s1661_s2 = smul.u32 80, %s2589_s24  ;;  %vm2156_vm12 = vmand %vm1109_vm8, %vm1110_vm9  ;;  %vm2557_vm14 = vcmask 1042432   ;;  %vm1164_vm15 = vsmask.f32 2304  ;;  %vm2556_vm4 = vcmask 564224   ;;  %vm1045_vm9 = vcmask 572416  }
  0x12   : > { %s248_s27 = scalar_lea.vmem %s2547_s0, %s1661_s2  ;;  %s1662_s2 = smul.u32 40, %s2589_s24 }
  0x13   : > { %v1784_v3 = vld [vmem:[%s248_s27 + $0x4] ss:$40 sps:$4 sm:$0xff]   ;;  %v1788_v5 = vld [vmem:[%s248_s27] ss:$40 sps:$4 sm:$0xff]   ;;  %v1790_v8 = vld [vmem:[%s248_s27 + $0x10] ss:$40 sps:$4 sm:$0xff]  }
  0x14   : > { %v1786_v4 = vld [vmem:[%s248_s27 + $0xc] ss:$40 sps:$4 sm:$0xff]   ;;  %330 = vmatprep.subr.bf16.mxu0 %v1784_v3  ;;  %v1789_v6 = vld [vmem:[%s248_s27 + $0x8] ss:$40 sps:$4 sm:$0xff]   ;;  %v1793_v10 = vld [vmem:[%s248_s27 + $0x18] ss:$40 sps:$4 sm:$0xff]  }
  0x15   : > { %371 = vmatprep.subr.bf16.mxu1 %v1786_v4  ;;  %v1792_v9 = vld [vmem:[%s248_s27 + $0x14] ss:$40 sps:$4 sm:$0xff]   ;;  %331 = vmatpush1.bf16.msra.mxu0 %v1788_v5  ;;  %v1798_v12 = vld [vmem:[%s248_s27 + $0x24] ss:$40 sps:$4 sm:$0xff]   ;;  %v1796_v13 = vld [vmem:[%s248_s27 + $0x20] ss:$40 sps:$4 sm:$0xff]  }
  0x16   : > { %372 = vmatpush1.bf16.msra.mxu1 %v1789_v6  ;;  %412 = vmatprep.subr.bf16.mxu0 %v1792_v9  ;;  %v1795_v11 = vld [vmem:[%s248_s27 + $0x1c] ss:$40 sps:$4 sm:$0xff]   ;;  %s2536_s27 = scalar_lea.vmem %s2553_s6, %s1662_s2 }
  0x17   : > { %453 = vmatprep.subr.bf16.mxu1 %v1795_v11 }
  0x18   : > { %1649 = vmatmul.mubr.msk.bf16.vlgmr.msra.gmra.mrb[0].mxu0 %vm326_vm0, %v255_v7 }
  0x19   : > { %1650 = vmatmul.mubr.msk.bf16.vlgmr.msra.gmra.mrb[0].mxu1 %vm326_vm0, %v255_v7  ;;  %413 = vmatpush1.bf16.msra.mxu0 %v1790_v8 }
  0x1a   : > { %454 = vmatpush1.bf16.msra.mxu1 %v1793_v10  ;;  %444 = vmatprep.mubr.bf16.mxu0 %v1807_v1  ;;  %v580_v10 = vrot.slane %v545_v20, %v579_v54  ;;  %v584_v20 = vrot.slane %v546_v14, %v1890_v16 }
  0x1b   : > { %485 = vmatprep.mubr.bf16.mxu1 %v1807_v1  ;;  %494 = vmatprep.subr.bf16.mxu0 %v1798_v12 }
  0x20   : > { %1651 = vmatmul.mubr.msk.bf16.vlgmr.msra.gmra.mrb[4].mxu0 %vm326_vm0, %v255_v7 }
  0x21   : > { %1652 = vmatmul.mubr.msk.bf16.vlgmr.msra.gmra.mrb[4].mxu1 %vm326_vm0, %v255_v7  ;;  %495 = vmatpush1.bf16.msra.mxu0 %v1796_v13 }
  0x22   : > { %526 = vmatprep.mubr.bf16.mxu0 %v1807_v1  ;;  %1377 = vmatprep.mubr.bf16.mxu1 %v1807_v1 }
  0x28   : > { %1653 = vmatmul.mubr.msk.bf16.vlgmr.msra.gmra.mrb[8].mxu0 %vm326_vm0, %v255_v7  ;;  %vm2555_vm0 = vcmask 1043456  }
  0x29   : > { %1418 = vmatprep.mubr.bf16.mxu0 %v1807_v1 }
  0x89   : > { %v270_v17 = vpop.permute.xlu0 %269 }
  0x8a   : > { %v1893_v18 = vrot.slane %v270_v17, %v1890_v16 }
  0xeb   : > { %v364_v23 = vpop.f32.mrb[0].mxu0 }
  0xec   : > { %v405_v24 = vpop.f32.mrb[0].mxu1  ;;  %v365_v25 = vadd.f32 %v364_v23, %v1893_v18  ;;  %v366_v28 = vpop.f32.mrb[1].mxu0 }
  0xed   : > { %v406_v27 = vadd.f32 %v405_v24, %v1893_v18  ;;  %v407_v29 = vpop.f32.mrb[1].mxu1  ;;  %v367_v31 = vadd.f32 %v366_v28, %v1893_v18  ;;  %v368_v33 = vpop.f32.mrb[2].mxu0  ;;  %v588_v28 = vrot.slane %v546_v14, %v555_v21 }
  0xee   : > { %v408_v32 = vadd.f32 %v407_v29, %v1893_v18  ;;  %v409_v34 = vpop.f32.mrb[2].mxu1  ;;  %v535_v35 = vmax.f32 %v365_v25, 0.0  ;;  %v369_v39 = vpop.f32.mrb[3].mxu0 }
  0xef   : > { %v537_v36 = vmax.f32 %v406_v27, 0.0  ;;  %v410_v40 = vpop.f32.mrb[3].mxu1  ;;  %v536_v41 = vmax.f32 %v367_v31, 0.0 }
  0xf0   : > { %v538_v42 = vmax.f32 %v408_v32, 0.0  ;;  %v599_v43 = vmul.f32 %v552_v26, %v535_v35 }
  0xf1   : > { %v601_v45 = vmul.f32 %v560_v30, %v537_v36  ;;  %v600_v49 = vmul.f32 %v556_v37, %v536_v41 }
  0xf2   : > { %v609_v48 = vpack.c.bf16 %v599_v43, %v599_v43  ;;  %v602_v50 = vmul.f32 %v564_v38, %v538_v42 }
  0xf3   : > { %v611_v51 = vpack.c.bf16 %v601_v45, %v601_v45  ;;  %v446_v52 = vpop.f32.mrb[4].mxu0  ;;  %v610_v3 = vpack.c.bf16 %v600_v49, %v600_v49 }
  0xf4   : > { %v487_v53 = vpop.f32.mrb[4].mxu1  ;;  %v447_v55 = vadd.f32 %v446_v52, %v1893_v18  ;;  %v448_v59 = vpop.f32.mrb[5].mxu0  ;;  %629 = vrot.lane.b32.xlu0 %v609_v48, %s1808_s8  ;;  %v612_v4 = vpack.c.bf16 %v602_v50, %v602_v50 }
  0xf5   : > { %v488_v57 = vadd.f32 %v487_v53, %v1893_v18  ;;  %v489_v58 = vpop.f32.mrb[5].mxu1  ;;  %633 = vrot.lane.b32.xlu1 %v611_v51, %s1808_s8  ;;  %v449_v62 = vadd.f32 %v448_v59, %v1893_v18  ;;  %v450_v0 = vpop.f32.mrb[6].mxu0 }
  0xf6   : > { %v490_v61 = vadd.f32 %v489_v58, %v1893_v18  ;;  %v491_v2 = vpop.f32.mrb[6].mxu1  ;;  %v539_v5 = vmax.f32 %v447_v55, 0.0  ;;  %v451_v7 = vpop.f32.mrb[7].mxu0 }
  0xf7   : > { %v541_v6 = vmax.f32 %v488_v57, 0.0  ;;  %v492_v8 = vpop.f32.mrb[7].mxu1  ;;  %v540_v11 = vmax.f32 %v449_v62, 0.0 }
  0xf8   : > { %v542_v9 = vmax.f32 %v490_v61, 0.0  ;;  %v603_v12 = vmul.f32 %v568_v56, %v539_v5  ;;  %635 = vrot.lane.b32.xlu0 %v612_v4, %s1808_s8 }
  0xf9   : > { %631 = vrot.lane.b32.xlu1 %v610_v3, %s1808_s8  ;;  %v604_v13 = vmul.f32 %v572_v63, %v540_v11  ;;  %v605_v19 = vmul.f32 %v576_v60, %v541_v6 }
  0xfa   : > { %v613_v17 = vpack.c.bf16 %v603_v12, %v603_v12  ;;  %v606_v22 = vmul.f32 %v580_v10, %v542_v9 }
  0xfb   : > { %v614_v23 = vpack.c.bf16 %v604_v13, %v604_v13  ;;  %v528_v24 = vpop.f32.mrb[8].mxu0  ;;  %v615_v30 = vpack.c.bf16 %v605_v19, %v605_v19 }
  0xfc   : > { %v529_v25 = vadd.f32 %v528_v24, %v1893_v18  ;;  %v530_v26 = vpop.f32.mrb[9].mxu0  ;;  %v616_v33 = vpack.c.bf16 %v606_v22, %v606_v22 }
  0xfd   : > { %637 = vrot.lane.b32.xlu1 %v613_v17, %s1808_s8  ;;  %v531_v27 = vadd.f32 %v530_v26, %v1893_v18  ;;  %639 = vrot.lane.b32.xlu0 %v614_v23, %s1808_s8  ;;  %v532_v29 = vpop.f32.mrb[10].mxu0 }
  0xfe   : > { %v543_v31 = vmax.f32 %v529_v25, 0.0  ;;  %v533_v32 = vpop.f32.mrb[11].mxu0 }
  0xff   : > { %v544_v34 = vmax.f32 %v531_v27, 0.0 }
 0x100   : > { %v607_v35 = vmul.f32 %v584_v20, %v543_v31 }
 0x101   : > { %641 = vrot.lane.b32.xlu1 %v615_v30, %s1808_s8  ;;  %v608_v16 = vmul.f32 %v588_v28, %v544_v34  ;;  %643 = vrot.lane.b32.xlu0 %v616_v33, %s1808_s8 }
 0x102   : > { %v617_v36 = vpack.c.bf16 %v607_v35, %v607_v35 }
 0x103   : > { %v618_v37 = vpack.c.bf16 %v608_v16, %v608_v16 }
 0x105   : > { %645 = vrot.lane.b32.xlu1 %v617_v36, %s1808_s8  ;;  %647 = vrot.lane.b32.xlu0 %v618_v37, %s1808_s8 }
 0x166   : > { %v630_v18 = vpop.permute.xlu0 %629 }
 0x167   : > { %v634_v15 = vpop.permute.xlu1 %633  ;;  %v1935_v21 = vsel %vm649_vm1, 0, %v630_v18 }
 0x168   : > { %v836_v38 = vrot.slane %v1935_v21, 6  ;;  %v746_v39 = vrot.slane %v1935_v21, 7  ;;  %v1015_v45 = vrot.slane %v1935_v21, 4  ;;  %v925_v49 = vrot.slane %v1935_v21, 5 }
 0x169   : > { %v1962_v50 = vshll.u32 %v1935_v21, 16 }
 0x16a   : > { %846 = vrot.lane.b32.xlu0 %v836_v38, %s1808_s8  ;;  %756 = vrot.lane.b32.xlu1 %v746_v39, %s1809_s11  ;;  %v636_v41 = vpop.permute.xlu0 %635 }
 0x16b   : > { %v632_v40 = vpop.permute.xlu1 %631  ;;  %v1948_v44 = vsel %vm649_vm1, %v634_v15, %v636_v41  ;;  %v786_v62 = vrot.slane %v1962_v50, 7  ;;  %v965_v8 = vrot.slane %v1962_v50, 5  ;;  %v875_v26 = vrot.slane %v1962_v50, 6 }
 0x16c   : > { %v1942_v42 = vsel %vm649_vm1, %v630_v18, %v632_v40  ;;  %v1945_v43 = vsel %vm649_vm1, %v632_v40, %v634_v15  ;;  %v1958_v48 = vshll.u32 %v1948_v44, 16  ;;  %v749_v63 = vrot.slane %v1948_v44, 7 }
 0x16d   : > { %v1952_v46 = vshll.u32 %v1942_v42, 16  ;;  %v1955_v47 = vshll.u32 %v1945_v43, 16  ;;  %v748_v53 = vrot.slane %v1945_v43, 7  ;;  %v747_v54 = vrot.slane %v1942_v42, 7 }
 0x16e   : > { %1025 = vrot.lane.b32.xlu0 %v1015_v45, %s1810_s12  ;;  %935 = vrot.lane.b32.xlu1 %v925_v49, %s1811_s13  ;;  %v837_v55 = vrot.slane %v1942_v42, 6  ;;  %v838_v56 = vrot.slane %v1945_v43, 6  ;;  %v927_v57 = vrot.slane %v1945_v43, 5  ;;  %v926_v58 = vrot.slane %v1942_v42, 5 }
 0x16f   : > { %v1683_v51 = vpack.i.bf16 %v1952_v46, %v1962_v50  ;;  %v1688_v52 = vpack.i.bf16 %v1958_v48, %v1955_v47  ;;  %v1016_v59 = vrot.slane %v1942_v42, 4  ;;  %v1017_v60 = vrot.slane %v1945_v43, 4  ;;  %v638_v7 = vpop.permute.xlu1 %637  ;;  %v640_v12 = vpop.permute.xlu0 %639 }
 0x170   : > { %v787_v61 = vrot.slane %v1952_v46, 7  ;;  %v877_v2 = vrot.slane %v1955_v47, 6  ;;  %v878_v3 = vrot.slane %v1958_v48, 6  ;;  %v839_v4 = vrot.slane %v1948_v44, 6 }
 0x171   : > { %v966_v6 = vrot.slane %v1952_v46, 5  ;;  %v928_v9 = vrot.slane %v1948_v44, 5  ;;  %v2002_v11 = vsel %vm649_vm1, %v636_v41, %v638_v7  ;;  %v1018_v13 = vrot.slane %v1948_v44, 4 }
 0x172   : > { %1684 = vrot.lane.b32.xlu1 %v1683_v51, %s1812_s14  ;;  %1689 = vrot.lane.b32.xlu0 %v1688_v52, %s1812_s14  ;;  %v1693_v0 = vpack.i.bf16 %v787_v61, %v786_v62  ;;  %v1708_v5 = vpack.i.bf16 %v878_v3, %v877_v2  ;;  %v750_v14 = vrot.slane %v2002_v11, 7  ;;  %v788_v17 = vrot.slane %v1955_v47, 7 }
 0x173   : > { %v1713_v10 = vpack.i.bf16 %v966_v6, %v965_v8  ;;  %v789_v19 = vrot.slane %v1958_v48, 7  ;;  %v840_v22 = vrot.slane %v2002_v11, 6  ;;  %v876_v24 = vrot.slane %v1952_v46, 6  ;;  %v642_v25 = vpop.permute.xlu1 %641  ;;  %v644_v20 = vpop.permute.xlu0 %643 }
 0x174   : > { %v2018_v27 = vsel %vm649_vm1, %v638_v7, %v640_v12  ;;  %v929_v28 = vrot.slane %v2002_v11, 5  ;;  %v967_v30 = vrot.slane %v1955_v47, 5  ;;  %v968_v31 = vrot.slane %v1958_v48, 5 }
 0x175   : > { %v1698_v23 = vpack.i.bf16 %v789_v19, %v788_v17  ;;  %v1703_v29 = vpack.i.bf16 %v876_v24, %v875_v26  ;;  %v2024_v32 = vsel %vm649_vm1, %v640_v12, %v642_v25  ;;  %v2027_v33 = vsel %vm649_vm1, %v642_v25, %v644_v20 }
 0x176   : > { %760 = vrot.lane.b32.xlu1 %v748_v53, %s1809_s11  ;;  %758 = vrot.lane.b32.xlu0 %v747_v54, %s1809_s11  ;;  %v688_v34 = vshll.u32 %v2002_v11, 16  ;;  %v691_v35 = vshll.u32 %v2018_v27, 16  ;;  %v2034_v16 = vshll.u32 %v2024_v32, 16  ;;  %v2037_v36 = vshll.u32 %v2027_v33, 16 }
 0x177   : > { %v1019_v37 = vrot.slane %v2002_v11, 4  ;;  %v1718_v15 = vpack.i.bf16 %v968_v31, %v967_v30  ;;  %v751_v39 = vrot.slane %v2018_v27, 7  ;;  %v752_v40 = vrot.slane %v2024_v32, 7  ;;  %v648_v61 = vpop.permute.xlu0 %647 }
 0x178   : > { %v1723_v18 = vpack.i.bf16 %v691_v35, %v688_v34  ;;  %v1728_v38 = vpack.i.bf16 %v2037_v36, %v2034_v16  ;;  %v841_v41 = vrot.slane %v2018_v27, 6  ;;  %v842_v45 = vrot.slane %v2024_v32, 6 }
 0x179   : > { %v930_v46 = vrot.slane %v2018_v27, 5  ;;  %v931_v47 = vrot.slane %v2024_v32, 5  ;;  %v1020_v48 = vrot.slane %v2018_v27, 4  ;;  %v1021_v49 = vrot.slane %v2024_v32, 4 }
 0x17a   : > { %848 = vrot.lane.b32.xlu1 %v837_v55, %s1808_s8  ;;  %850 = vrot.lane.b32.xlu0 %v838_v56, %s1808_s8  ;;  %v790_v50 = vrot.slane %v688_v34, 7  ;;  %v791_v51 = vrot.slane %v691_v35, 7  ;;  %v753_v53 = vrot.slane %v2027_v33, 7  ;;  %v879_v54 = vrot.slane %v688_v34, 6 }
 0x17b   : > { %v880_v55 = vrot.slane %v691_v35, 6  ;;  %v793_v6 = vrot.slane %v2037_v36, 7  ;;  %v882_v12 = vrot.slane %v2037_v36, 6  ;;  %v971_v19 = vrot.slane %v2034_v16, 5 }
 0x17c   : > { %v1733_v52 = vpack.i.bf16 %v791_v51, %v790_v50 }
 0x17d   : > { %v1743_v56 = vpack.i.bf16 %v880_v55, %v879_v54 }
 0x17e   : > { %939 = vrot.lane.b32.xlu1 %v927_v57, %s1811_s13  ;;  %937 = vrot.lane.b32.xlu0 %v926_v58, %s1811_s13  ;;  %v843_v57 = vrot.slane %v2027_v33, 6  ;;  %v969_v58 = vrot.slane %v688_v34, 5 }
 0x182   : > { %1027 = vrot.lane.b32.xlu1 %v1016_v59, %s1810_s12  ;;  %1029 = vrot.lane.b32.xlu0 %v1017_v60, %s1810_s12  ;;  %v970_v59 = vrot.slane %v691_v35, 5  ;;  %v646_v60 = vpop.permute.xlu1 %645 }
 0x183   : > { %v658_v2 = vsel %vm649_vm1, %v646_v60, %v648_v61 }
 0x184   : > { %v1753_v62 = vpack.i.bf16 %v970_v59, %v969_v58  ;;  %v2081_v7 = vsel %vm672_vm2, %v658_v2, 0  ;;  %vm1218_vm2 = vsmask.f32 3328 }
 0x185   : > { %v845_v34 = vrot.slane %v2081_v7, 6 }
 0x186   : > { %762 = vrot.lane.b32.xlu1 %v749_v63, %s1809_s11  ;;  %1694 = vrot.lane.b32.xlu0 %v1693_v0, %s1813_s15  ;;  %v932_v63 = vrot.slane %v2027_v33, 5  ;;  %v2070_v0 = vsel %vm649_vm1, %v644_v20, %v646_v60 }
 0x187   : > { %v754_v3 = vrot.slane %v2070_v0, 7  ;;  %v844_v8 = vrot.slane %v2070_v0, 6 }
 0x18a   : > { %852 = vrot.lane.b32.xlu1 %v839_v4, %s1808_s8  ;;  %1709 = vrot.lane.b32.xlu0 %v1708_v5, %s1814_s16  ;;  %v1022_v4 = vrot.slane %v2027_v33, 4  ;;  %v792_v5 = vrot.slane %v2034_v16, 7 }
 0x18e   : > { %941 = vrot.lane.b32.xlu1 %v928_v9, %s1811_s13  ;;  %1714 = vrot.lane.b32.xlu0 %v1713_v10, %s1815_s17  ;;  %v1738_v9 = vpack.i.bf16 %v793_v6, %v792_v5  ;;  %v881_v10 = vrot.slane %v2034_v16, 6 }
 0x190   : > { %v1748_v17 = vpack.i.bf16 %v882_v12, %v881_v10 }
 0x192   : > { %1031 = vrot.lane.b32.xlu1 %v1018_v13, %s1810_s12  ;;  %764 = vrot.lane.b32.xlu0 %v750_v14, %s1809_s11  ;;  %v702_v13 = vshll.u32 %v2081_v7, 16  ;;  %v933_v14 = vrot.slane %v2070_v0, 5 }
 0x194   : > { %v795_v20 = vrot.slane %v702_v13, 7  ;;  %v884_v30 = vrot.slane %v702_v13, 6  ;;  %v974_v16 = vrot.slane %v702_v13, 5 }
 0x196   : > { %854 = vrot.lane.b32.xlu0 %v840_v22, %s1808_s8  ;;  %1699 = vrot.lane.b32.xlu1 %v1698_v23, %s1813_s15  ;;  %v972_v22 = vrot.slane %v2037_v36, 5  ;;  %v700_v23 = vshll.u32 %v2070_v0, 16 }
 0x198   : > { %v1758_v24 = vpack.i.bf16 %v972_v22, %v971_v19  ;;  %v1763_v25 = vpack.i.bf16 %v702_v13, %v700_v23  ;;  %v794_v26 = vrot.slane %v700_v23, 7  ;;  %v883_v31 = vrot.slane %v700_v23, 6 }
 0x199   : > { %v973_v36 = vrot.slane %v700_v23, 5 }
 0x19a   : > { %943 = vrot.lane.b32.xlu0 %v929_v28, %s1811_s13  ;;  %1704 = vrot.lane.b32.xlu1 %v1703_v29, %s1814_s16  ;;  %v755_v28 = vrot.slane %v2081_v7, 7  ;;  %v1768_v29 = vpack.i.bf16 %v795_v20, %v794_v26  ;;  %v1773_v35 = vpack.i.bf16 %v884_v30, %v883_v31 }
 0x19e   : > { %1033 = vrot.lane.b32.xlu0 %v1019_v37, %s1810_s12  ;;  %1719 = vrot.lane.b32.xlu1 %v1718_v15, %s1815_s17  ;;  %v934_v37 = vrot.slane %v2081_v7, 5  ;;  %v1778_v15 = vpack.i.bf16 %v974_v16, %v973_v36 }
 0x1a2   : > { %1724 = vrot.lane.b32.xlu1 %v1723_v18, %s1812_s14  ;;  %1729 = vrot.lane.b32.xlu0 %v1728_v38, %s1812_s14 }
 0x1a6   : > { %766 = vrot.lane.b32.xlu1 %v751_v39, %s1809_s11  ;;  %768 = vrot.lane.b32.xlu0 %v752_v40, %s1809_s11  ;;  %v1024_v39 = vrot.slane %v2081_v7, 4  ;;  %v1023_v40 = vrot.slane %v2070_v0, 4 }
 0x1aa   : > { %856 = vrot.lane.b32.xlu1 %v841_v41, %s1808_s8  ;;  %858 = vrot.lane.b32.xlu0 %v842_v45, %s1808_s8 }
 0x1ae   : > { %945 = vrot.lane.b32.xlu1 %v930_v46, %s1811_s13  ;;  %947 = vrot.lane.b32.xlu0 %v931_v47, %s1811_s13 }
 0x1b2   : > { %1035 = vrot.lane.b32.xlu1 %v1020_v48, %s1810_s12  ;;  %1037 = vrot.lane.b32.xlu0 %v1021_v49, %s1810_s12 }
 0x1b6   : > { %1734 = vrot.lane.b32.xlu1 %v1733_v52, %s1813_s15  ;;  %770 = vrot.lane.b32.xlu0 %v753_v53, %s1809_s11 }
 0x1ba   : > { %1744 = vrot.lane.b32.xlu1 %v1743_v56, %s1814_s16  ;;  %860 = vrot.lane.b32.xlu0 %v843_v57, %s1808_s8 }
 0x1be   : > { %1754 = vrot.lane.b32.xlu1 %v1753_v62, %s1815_s17  ;;  %949 = vrot.lane.b32.xlu0 %v932_v63, %s1811_s13 }
 0x1c2   : > { %772 = vrot.lane.b32.xlu1 %v754_v3, %s1809_s11  ;;  %1039 = vrot.lane.b32.xlu0 %v1022_v4, %s1810_s12 }
 0x1c6   : > { %862 = vrot.lane.b32.xlu1 %v844_v8, %s1808_s8  ;;  %1739 = vrot.lane.b32.xlu0 %v1738_v9, %s1813_s15 }
 0x1ca   : > { %951 = vrot.lane.b32.xlu1 %v933_v14, %s1811_s13  ;;  %1749 = vrot.lane.b32.xlu0 %v1748_v17, %s1814_s16 }
 0x1ce   : > { %1759 = vrot.lane.b32.xlu0 %v1758_v24, %s1815_s17  ;;  %1764 = vrot.lane.b32.xlu1 %v1763_v25, %s1812_s14 }
 0x1d2   : > { %774 = vrot.lane.b32.xlu0 %v755_v28, %s1809_s11  ;;  %1769 = vrot.lane.b32.xlu1 %v1768_v29, %s1813_s15 }
 0x1d6   : > { %864 = vrot.lane.b32.xlu0 %v845_v34, %s1808_s8  ;;  %1774 = vrot.lane.b32.xlu1 %v1773_v35, %s1814_s16 }
 0x1da   : > { %953 = vrot.lane.b32.xlu0 %v934_v37, %s1811_s13  ;;  %1779 = vrot.lane.b32.xlu1 %v1778_v15, %s1815_s17 }
 0x1dc   : > { %v757_v18 = vpop.permute.xlu1 %756  ;;  %v2106_v38 = vpop.permute.xlu0 %846 }
 0x1de   : > { %1043 = vrot.lane.b32.xlu0 %v1024_v39, %s1810_s12  ;;  %1041 = vrot.lane.b32.xlu1 %v1023_v40, %s1810_s12 }
 0x1e0   : > { %v2112_v41 = vpop.permute.xlu1 %935  ;;  %v2114_v45 = vpop.permute.xlu0 %1025 }
 0x1e4   : > { %v1685_v46 = vpop.permute.xlu1 %1684  ;;  %v2116_v47 = vpop.permute.xlu0 %1689 }
 0x1e5   : > { %v1687_v60 = vunpack.i.h.bf16 %v1685_v46  ;;  %v1686_v61 = vunpack.i.l.bf16 %v1685_v46  ;;  %v1691_v62 = vunpack.i.l.bf16 %v2116_v47  ;;  %v1692_v4 = vunpack.i.h.bf16 %v2116_v47 }
 0x1e7   : > { %v725_v5 = vsel %vm724_vm5, %v1686_v61, %v1687_v60  ;;  %v726_v6 = vsel %vm724_vm5, %v1687_v60, %v1691_v62  ;;  %v1058_v13 = vsel %vm2138_vm6, %v1935_v21, %v1686_v61  ;;  %v727_v14 = vsel %vm724_vm5, %v1691_v62, %v1692_v4 }
 0x1e8   : > { %v761_v48 = vpop.permute.xlu1 %760  ;;  %v759_v49 = vpop.permute.xlu0 %758  ;;  %v1059_v19 = vsel %vm2138_vm6, %v1942_v42, %v725_v5  ;;  %v1060_v23 = vsel %vm2138_vm6, %v1945_v43, %v726_v6  ;;  %v1071_v24 = vsel %vm1055_vm3, %v1058_v13, %v757_v18  ;;  %v1061_v35 = vsel %vm2138_vm6, %v1948_v44, %v727_v14 }
 0x1e9   : > { %v777_v21 = vsel %vm2554_vm7, %v757_v18, %v759_v49  ;;  %v778_v22 = vsel %vm2554_vm7, %v759_v49, %v761_v48 }
 0x1ea   : > { %v1075_v30 = vsel %vm1055_vm3, %v1059_v19, %v777_v21  ;;  %v1079_v31 = vsel %vm1055_vm3, %v1060_v23, %v778_v22 }
 0x1ec   : > { %v849_v50 = vpop.permute.xlu1 %848  ;;  %v851_v51 = vpop.permute.xlu0 %850 }
 0x1ed   : > { %v866_v34 = vsel %vm649_vm1, %v2106_v38, %v849_v50  ;;  %v867_v16 = vsel %vm649_vm1, %v849_v50, %v851_v51 }
 0x1f0   : > { %v2118_v52 = vpop.permute.xlu1 %939  ;;  %v2120_v53 = vpop.permute.xlu0 %937 }
 0x1f4   : > { %v2122_v54 = vpop.permute.xlu1 %1027  ;;  %v2124_v55 = vpop.permute.xlu0 %1029 }
 0x1f8   : > { %v2126_v56 = vpop.permute.xlu1 %762  ;;  %v1695_v57 = vpop.permute.xlu0 %1694 }
 0x1f9   : > { %v1697_v8 = vunpack.i.h.bf16 %v1695_v57  ;;  %v1696_v9 = vunpack.i.l.bf16 %v1695_v57  ;;  %v779_v42 = vsel %vm2554_vm7, %v761_v48, %v2126_v56  ;;  %vm2201_vm7 = vmand %vm2557_vm14, %vm1164_vm15 }
 0x1fa   : > { %v1083_v18 = vsel %vm1055_vm3, %v1061_v35, %v779_v42  ;;  %vm2217_vm15 = vmand %vm2555_vm0, %vm1218_vm2  ;;  %vm2566_vm2 = vcmask 15360  }
 0x1fb   : > { %v817_v25 = vsel %vm816_vm10, %v1696_v9, %v1697_v8  ;;  %v1112_v28 = vsel %vm2156_vm12, %v1071_v24, %v1696_v9 }
 0x1fc   : > { %v2128_v58 = vpop.permute.xlu1 %852  ;;  %v2130_v59 = vpop.permute.xlu0 %1709  ;;  %v1113_v36 = vsel %vm2156_vm12, %v1075_v30, %v817_v25  ;;  %v1125_v48 = vsel %vm1109_vm8, %v1112_v28, %v2106_v38  ;;  %v956_v25 = vsel %vm955_vm11, %v2112_v41, %v2120_v53  ;;  %v957_v30 = vsel %vm955_vm11, %v2120_v53, %v2118_v52 }
 0x1fd   : > { %v868_v39 = vsel %vm649_vm1, %v851_v51, %v2128_v58  ;;  %v1711_v50 = vunpack.i.l.bf16 %v2130_v59  ;;  %v1712_v61 = vunpack.i.h.bf16 %v2130_v59  ;;  %v1129_v38 = vsel %vm1109_vm8, %v1113_v36, %v866_v34 }
 0x200   : > { %v2133_v63 = vpop.permute.xlu1 %941  ;;  %v2135_v2 = vpop.permute.xlu0 %1714 }
 0x201   : > { %v1717_v62 = vunpack.i.h.bf16 %v2135_v2  ;;  %v1716_v5 = vunpack.i.l.bf16 %v2135_v2 }
 0x203   : > { %v996_v36 = vsel %vm2556_vm4, %v1716_v5, %v1717_v62 }
 0x204   : > { %v2145_v10 = vpop.permute.xlu1 %1031  ;;  %v2147_v12 = vpop.permute.xlu0 %764 }
 0x208   : > { %v2170_v20 = vpop.permute.xlu1 %1699  ;;  %v2172_v26 = vpop.permute.xlu0 %854 }
 0x209   : > { %v1702_v29 = vunpack.i.h.bf16 %v2170_v20  ;;  %v1701_v43 = vunpack.i.l.bf16 %v2170_v20  ;;  %v869_v20 = vsel %vm649_vm1, %v2128_v58, %v2172_v26 }
 0x20b   : > { %v818_v37 = vsel %vm816_vm10, %v1697_v8, %v1701_v43  ;;  %v819_v15 = vsel %vm816_vm10, %v1701_v43, %v1702_v29 }
 0x20c   : > { %v1114_v40 = vsel %vm2156_vm12, %v1079_v31, %v818_v37  ;;  %v1705_v46 = vpop.permute.xlu1 %1704  ;;  %v2207_v49 = vpop.permute.xlu0 %943  ;;  %v1115_v51 = vsel %vm2156_vm12, %v1083_v18, %v819_v15  ;;  %v908_v31 = vsel %vm905_vm13, %v1711_v50, %v1712_v61 }
 0x20d   : > { %v1707_v57 = vunpack.i.h.bf16 %v1705_v46  ;;  %v1706_v60 = vunpack.i.l.bf16 %v1705_v46  ;;  %v1133_v14 = vsel %vm1109_vm8, %v1114_v40, %v867_v16  ;;  %v1137_v24 = vsel %vm1109_vm8, %v1115_v51, %v868_v39 }
 0x20e   : > { %v1169_v53 = vsel %vm2201_vm7, %v1137_v24, %v908_v31  ;;  %v1047_v46 = vsel %vm1045_vm9, %v2122_v54, %v2124_v55 }
 0x20f   : > { %v906_v8 = vsel %vm905_vm13, %v1706_v60, %v1707_v57  ;;  %v907_v9 = vsel %vm905_vm13, %v1707_v57, %v1711_v50  ;;  %v1166_v13 = vsel %vm2201_vm7, %v1125_v48, %v1706_v60  ;;  %v958_v48 = vsel %vm955_vm11, %v2118_v52, %v2133_v63 }
 0x210   : > { %v2227_v19 = vpop.permute.xlu1 %1719  ;;  %v2229_v2 = vpop.permute.xlu0 %1033  ;;  %v1179_v21 = vsel %vm2557_vm14, %v1166_v13, %v2112_v41  ;;  %v1168_v22 = vsel %vm2201_vm7, %v1133_v14, %v907_v9  ;;  %v1167_v23 = vsel %vm2201_vm7, %v1129_v38, %v906_v8  ;;  %v1046_v50 = vsel %vm1045_vm9, %v2114_v45, %v2122_v54 }
 0x211   : > { %v1722_v42 = vunpack.i.h.bf16 %v2227_v19  ;;  %v1721_v28 = vunpack.i.l.bf16 %v2227_v19  ;;  %v1220_v43 = vsel %vm2217_vm15, %v1179_v21, %v1716_v5  ;;  %v1183_v41 = vsel %vm2557_vm14, %v1167_v23, %v956_v25 }
 0x212   : > { %v1233_v34 = vsel %vm2555_vm0, %v1220_v43, %v2114_v45  ;;  %v1187_v16 = vsel %vm2557_vm14, %v1168_v22, %v957_v30  ;;  %v1221_v39 = vsel %vm2217_vm15, %v1183_v41, %v996_v36  ;;  %v1191_v57 = vsel %vm2557_vm14, %v1169_v53, %v958_v48 }
 0x213   : > { %1278 = vrot.lane.b32.xlu1 %v1233_v34, %s1816_s18  ;;  %v997_v35 = vsel %vm2556_vm4, %v1717_v62, %v1721_v28  ;;  %v998_v40 = vsel %vm2556_vm4, %v1721_v28, %v1722_v42  ;;  %v1236_v60 = vsel %vm2555_vm0, %v1221_v39, %v1046_v50  ;;  %v1048_v45 = vsel %vm1045_vm9, %v2124_v55, %v2145_v10 }
 0x214   : > { %v2260_v37 = vpop.permute.xlu1 %1724  ;;  %v2262_v15 = vpop.permute.xlu0 %1729  ;;  %v1222_v18 = vsel %vm2217_vm15, %v1187_v16, %v997_v35  ;;  %v1223_v62 = vsel %vm2217_vm15, %v1191_v57, %v998_v40  ;;  %v959_v57 = vsel %vm955_vm11, %v2133_v63, %v2207_v49  ;;  %v1049_v63 = vsel %vm1045_vm9, %v2145_v10, %v2229_v2 }
 0x215   : > { %v1239_v51 = vsel %vm2555_vm0, %v1222_v18, %v1047_v46  ;;  %v1242_v54 = vsel %vm2555_vm0, %v1223_v62, %v1048_v45  ;;  %v1727_v14 = vunpack.i.h.bf16 %v2260_v37  ;;  %v1726_v21 = vunpack.i.l.bf16 %v2260_v37  ;;  %vm2567_vm0 = vmmov %vm2566_vm2 }
 0x216   : > { %1282 = vrot.lane.b32.xlu0 %v1239_v51, %s1816_s18  ;;  %v1731_v59 = vunpack.i.l.bf16 %v2262_v15 }
 0x217   : > { %1280 = vrot.lane.b32.xlu1 %v1236_v60, %s1816_s18  ;;  %v728_v55 = vsel %vm724_vm5, %v1692_v4, %v1726_v21  ;;  %v729_v24 = vsel %vm724_vm5, %v1726_v21, %v1727_v14  ;;  %v780_v4 = vsel %vm2567_vm0, %v2126_v56, %v2147_v12  ;;  %v1732_v60 = vunpack.i.h.bf16 %v2262_v15 }
 0x218   : > { %v2287_v5 = vpop.permute.xlu1 %766  ;;  %v2289_v52 = vpop.permute.xlu0 %768  ;;  %v1062_v25 = vsel %vm2138_vm6, %v2002_v11, %v728_v55  ;;  %v1063_v43 = vsel %vm2138_vm6, %v2018_v27, %v729_v24  ;;  %vm2568_vm0 = vcmask 1043456  }
 0x219   : > { %v781_v28 = vsel %vm2566_vm2, %v2147_v12, %v2287_v5  ;;  %v1087_v16 = vsel %vm1055_vm3, %v1062_v25, %v780_v4  ;;  %v730_v25 = vsel %vm724_vm5, %v1727_v14, %v1731_v59  ;;  %vm2569_vm2 = vmmov %vm2568_vm0  ;;  %v731_v10 = vsel %vm724_vm5, %v1731_v59, %v1732_v60 }
 0x21a   : > { %1284 = vrot.lane.b32.xlu0 %v1242_v54, %s1816_s18  ;;  %v1091_v41 = vsel %vm1055_vm3, %v1063_v43, %v781_v28 }
 0x21c   : > { %v2296_v38 = vpop.permute.xlu1 %856  ;;  %v2298_v8 = vpop.permute.xlu0 %858 }
 0x220   : > { %v2300_v9 = vpop.permute.xlu1 %945  ;;  %v2302_v13 = vpop.permute.xlu0 %947 }
 0x221   : > { %v960_v62 = vsel %vm955_vm11, %v2207_v49, %v2300_v9 }
 0x224   : > { %v2306_v22 = vpop.permute.xlu1 %1035  ;;  %v2308_v23 = vpop.permute.xlu0 %1037 }
 0x225   : > { %v1050_v15 = vsel %vm1045_vm9, %v2229_v2, %v2306_v22 }
 0x228   : > { %v1735_v30 = vpop.permute.xlu1 %1734  ;;  %v2323_v31 = vpop.permute.xlu0 %770 }
 0x229   : > { %v1737_v47 = vunpack.i.h.bf16 %v1735_v30  ;;  %v1736_v34 = vunpack.i.l.bf16 %v1735_v30  ;;  %v1064_v30 = vsel %vm2138_vm6, %v2024_v32, %v730_v25 }
 0x22b   : > { %v820_v11 = vsel %vm816_vm10, %v1702_v29, %v1736_v34  ;;  %v821_v35 = vsel %vm816_vm10, %v1736_v34, %v1737_v47  ;;  %v870_v29 = vsel %vm649_vm1, %v2172_v26, %v2296_v38 }
 0x22c   : > { %v1116_v27 = vsel %vm2156_vm12, %v1087_v16, %v820_v11  ;;  %v1117_v36 = vsel %vm2156_vm12, %v1091_v41, %v821_v35  ;;  %v1745_v53 = vpop.permute.xlu1 %1744  ;;  %v2338_v37 = vpop.permute.xlu0 %860  ;;  %v1065_v35 = vsel %vm2138_vm6, %v2027_v33, %v731_v10  ;;  %v871_v33 = vsel %vm649_vm1, %v2296_v38, %v2298_v8 }
 0x22d   : > { %v1747_v56 = vunpack.i.h.bf16 %v1745_v53  ;;  %v1746_v12 = vunpack.i.l.bf16 %v1745_v53  ;;  %v1141_v40 = vsel %vm1109_vm8, %v1116_v27, %v869_v20  ;;  %v1145_v46 = vsel %vm1109_vm8, %v1117_v36, %v870_v29 }
 0x22f   : > { %v909_v18 = vsel %vm905_vm13, %v1712_v61, %v1746_v12  ;;  %v910_v39 = vsel %vm905_vm13, %v1746_v12, %v1747_v56 }
 0x230   : > { %v2352_v48 = vpop.permute.xlu1 %1754  ;;  %v2354_v50 = vpop.permute.xlu0 %949  ;;  %v1170_v58 = vsel %vm2201_vm7, %v1141_v40, %v909_v18  ;;  %v1171_v26 = vsel %vm2201_vm7, %v1145_v46, %v910_v39 }
 0x231   : > { %v1757_v61 = vunpack.i.h.bf16 %v2352_v48  ;;  %v1756_v51 = vunpack.i.l.bf16 %v2352_v48  ;;  %v1195_v54 = vsel %vm2557_vm14, %v1170_v58, %v959_v57  ;;  %v1199_v55 = vsel %vm2557_vm14, %v1171_v26, %v960_v62 }
 0x232   : > { %v961_v48 = vsel %vm955_vm11, %v2300_v9, %v2302_v13  ;;  %v962_v38 = vsel %vm955_vm11, %v2302_v13, %v2354_v50  ;;  %v1051_v9 = vsel %vm1045_vm9, %v2306_v22, %v2308_v23 }
 0x233   : > { %v999_v45 = vsel %vm2556_vm4, %v1722_v42, %v1756_v51  ;;  %v1000_v21 = vsel %vm2556_vm4, %v1756_v51, %v1757_v61  ;;  %vm2570_vm4 = vcmask 15360  }
 0x234   : > { %v773_v24 = vpop.permute.xlu1 %772  ;;  %v2382_v49 = vpop.permute.xlu0 %1039  ;;  %v1224_v19 = vsel %vm2217_vm15, %v1195_v54, %v999_v45  ;;  %v1225_v42 = vsel %vm2217_vm15, %v1199_v55, %v1000_v21  ;;  %v782_v2 = vsel %vm2570_vm4, %v2287_v5, %v2289_v52  ;;  %vm2571_vm14 = vmmov %vm2570_vm4 }
 0x235   : > { %v1245_v28 = vsel %vm2568_vm0, %v1224_v19, %v1049_v63  ;;  %v1248_v43 = vsel %vm2569_vm2, %v1225_v42, %v1050_v15  ;;  %v783_v14 = vsel %vm2571_vm14, %v2289_v52, %v2323_v31  ;;  %v1095_v16 = vsel %vm1055_vm3, %v1064_v30, %v782_v2 }
 0x236   : > { %1286 = vrot.lane.b32.xlu1 %v1245_v28, %s1816_s18  ;;  %1288 = vrot.lane.b32.xlu0 %v1248_v43, %s1816_s18  ;;  %v1099_v5 = vsel %vm1055_vm3, %v1065_v35, %v783_v14  ;;  %vm2572_vm14 = vcmask 1042432   ;;  %vm2574_vm0 = vcmask 564224  }
 0x237   : > { %vm2573_vm4 = vmmov %vm2572_vm14 }
 0x238   : > { %v2403_v34 = vpop.permute.xlu1 %862  ;;  %v1740_v4 = vpop.permute.xlu0 %1739  ;;  %vm2575_vm2 = vmmov %vm2574_vm0 }
 0x239   : > { %v1742_v41 = vunpack.i.h.bf16 %v1740_v4  ;;  %v1741_v11 = vunpack.i.l.bf16 %v1740_v4 }
 0x23b   : > { %v822_v27 = vsel %vm816_vm10, %v1737_v47, %v1741_v11  ;;  %v823_v32 = vsel %vm816_vm10, %v1741_v11, %v1742_v41  ;;  %v872_v47 = vsel %vm649_vm1, %v2298_v8, %v2338_v37 }
 0x23c   : > { %v1118_v52 = vsel %vm2156_vm12, %v1095_v16, %v822_v27  ;;  %v1119_v36 = vsel %vm2156_vm12, %v1099_v5, %v823_v32  ;;  %v2416_v53 = vpop.permute.xlu1 %951  ;;  %v1750_v12 = vpop.permute.xlu0 %1749  ;;  %v873_v5 = vsel %vm649_vm1, %v2338_v37, %v2403_v34 }
 0x23d   : > { %v1752_v20 = vunpack.i.h.bf16 %v1750_v12  ;;  %v1751_v29 = vunpack.i.l.bf16 %v1750_v12  ;;  %v1149_v40 = vsel %vm1109_vm8, %v1118_v52, %v871_v33  ;;  %v1153_v46 = vsel %vm1109_vm8, %v1119_v36, %v872_v47 }
 0x23f   : > { %v911_v18 = vsel %vm905_vm13, %v1747_v56, %v1751_v29  ;;  %v912_v39 = vsel %vm905_vm13, %v1751_v29, %v1752_v20 }
 0x240   : > { %v1765_v58 = vpop.permute.xlu1 %1764  ;;  %v1760_v26 = vpop.permute.xlu0 %1759  ;;  %v1172_v8 = vsel %vm2201_vm7, %v1149_v40, %v911_v18  ;;  %v1173_v56 = vsel %vm2201_vm7, %v1153_v46, %v912_v39 }
 0x241   : > { %v1767_v59 = vunpack.i.h.bf16 %v1765_v58  ;;  %v1766_v51 = vunpack.i.l.bf16 %v1765_v58  ;;  %v1762_v57 = vunpack.i.h.bf16 %v1760_v26  ;;  %v1761_v62 = vunpack.i.l.bf16 %v1760_v26 }
 0x242   : > { %v1203_v45 = vsel %vm2572_vm14, %v1172_v8, %v961_v48  ;;  %v1207_v13 = vsel %vm2573_vm4, %v1173_v56, %v962_v38  ;;  %v1262_v56 = vld [vmem:[%s2552_s5] sm:$0xf] }
 0x243   : > { %v732_v54 = vsel %vm724_vm5, %v1732_v60, %v1766_v51  ;;  %v733_v21 = vsel %vm724_vm5, %v1766_v51, %v1767_v59  ;;  %v1001_v55 = vsel %vm2574_vm0, %v1757_v61, %v1761_v62  ;;  %v1002_v63 = vsel %vm2575_vm2, %v1761_v62, %v1762_v57 }
 0x244   : > { %v1066_v15 = vsel %vm2138_vm6, %v2070_v0, %v732_v54  ;;  %v1770_v19 = vpop.permute.xlu1 %1769  ;;  %v1067_v22 = vsel %vm2138_vm6, %v2081_v7, %v733_v21  ;;  %v775_v42 = vpop.permute.xlu0 %774  ;;  %v1226_v25 = vsel %vm2217_vm15, %v1203_v45, %v1001_v55  ;;  %v1227_v60 = vsel %vm2217_vm15, %v1207_v13, %v1002_v63  ;;  %v1261_v21 = vld [vmem:[%s2551_s4] sm:$0x3] }
 0x245   : > { %v1052_v61 = vsel %vm1045_vm9, %v2308_v23, %v2382_v49  ;;  %v1772_v28 = vunpack.i.h.bf16 %v1770_v19  ;;  %v1771_v43 = vunpack.i.l.bf16 %v1770_v19  ;;  %vm2576_vm5 = vcmask 15360  }
 0x246   : > { %v785_v0 = vsel %vm2576_vm5, %v773_v24, %v775_v42  ;;  %vm2577_vm14 = vmmov %vm2576_vm5  ;;  %vm2578_vm6 = vcmask 1043456   ;;  %v1817_v59 = vmov 65535  }
 0x247   : > { %v784_v10 = vsel %vm2577_vm14, %v2323_v31, %v773_v24  ;;  %v1107_v7 = vsel %vm1055_vm3, %v1067_v22, %v785_v0  ;;  %v1251_v3 = vsel %vm2578_vm6, %v1226_v25, %v1051_v9  ;;  %vm2579_vm4 = vmmov %vm2578_vm6  ;;  %v824_v30 = vsel %vm816_vm10, %v1742_v41, %v1771_v43 }
 0x248   : > { %v1254_v2 = vsel %vm2579_vm4, %v1227_v60, %v1052_v61  ;;  %v825_v14 = vsel %vm816_vm10, %v1771_v43, %v1772_v28  ;;  %v1103_v4 = vsel %vm1055_vm3, %v1066_v15, %v784_v10  ;;  %1290 = vrot.lane.b32.xlu1 %v1251_v3, %s1816_s18  ;;  %v1775_v31 = vpop.permute.xlu1 %1774  ;;  %v865_v11 = vpop.permute.xlu0 %864  ;;  %vm2581_vm3 = vmmov %vm2574_vm0 }
 0x249   : > { %1292 = vrot.lane.b32.xlu0 %v1254_v2, %s1816_s18  ;;  %v1120_v23 = vsel %vm2156_vm12, %v1103_v4, %v824_v30  ;;  %v1121_v24 = vsel %vm2156_vm12, %v1107_v7, %v825_v14  ;;  %v1777_v35 = vunpack.i.h.bf16 %v1775_v31  ;;  %v1776_v16 = vunpack.i.l.bf16 %v1775_v31  ;;  %vm2583_vm10 = vmmov %vm2574_vm0 }
 0x24a   : > { %v874_v41 = vsel %vm649_vm1, %v2403_v34, %v865_v11  ;;  %v1157_v36 = vsel %vm1109_vm8, %v1120_v23, %v873_v5  ;;  %v963_v34 = vsel %vm955_vm11, %v2354_v50, %v2416_v53  ;;  %vm2580_vm1 = vcmask 1042432   ;;  %vm2587_vm2 = vmmov %vm2579_vm4 }
 0x24b   : > { %v1161_v27 = vsel %vm1109_vm8, %v1121_v24, %v874_v41  ;;  %v913_v32 = vsel %vm905_vm13, %v1752_v20, %v1776_v16  ;;  %v914_v52 = vsel %vm905_vm13, %v1776_v16, %v1777_v35  ;;  %vm2582_vm8 = vmmov %vm2580_vm1  ;;  %vm1312_vm12 = vcmask 1044480  }
 0x24c   : > { %v1780_v17 = vpop.permute.xlu1 %1779  ;;  %v1175_v12 = vsel %vm2201_vm7, %v1161_v27, %v914_v52  ;;  %v954_v29 = vpop.permute.xlu0 %953  ;;  %v1174_v33 = vsel %vm2201_vm7, %v1157_v36, %v913_v32  ;;  %vm2584_vm7 = vmmov %vm2579_vm4  ;;  %vm1574_vm0 = vcmask 31748  }
 0x24d   : > { %v1782_v47 = vunpack.i.h.bf16 %v1780_v17  ;;  %v1781_v18 = vunpack.i.l.bf16 %v1780_v17  ;;  %v964_v37 = vsel %vm955_vm11, %v2416_v53, %v954_v29  ;;  %v1211_v40 = vsel %vm2582_vm8, %v1174_v33, %v963_v34  ;;  %vm2585_vm11 = vmmov %vm2579_vm4 }
 0x24e   : > { %v1215_v20 = vsel %vm2580_vm1, %v1175_v12, %v964_v37  ;;  %vm2586_vm13 = vmmov %vm2579_vm4 }
 0x24f   : > { %v1003_v39 = vsel %vm2581_vm3, %v1762_v57, %v1781_v18  ;;  %v1004_v46 = vsel %vm2583_vm10, %v1781_v18, %v1782_v47  ;;  %vm1575_vm5 = vmor %vm1574_vm0, %vm2587_vm2 }
 0x250   : > { %v1042_v48 = vpop.permute.xlu1 %1041  ;;  %v1044_v44 = vpop.permute.xlu0 %1043  ;;  %v1228_v38 = vsel %vm2217_vm15, %v1211_v40, %v1003_v39  ;;  %v1229_v58 = vsel %vm2217_vm15, %v1215_v20, %v1004_v46  ;;  %vm1298_vm15 = vcmask 474112  }
 0x251   : > { %v1053_v26 = vsel %vm1045_vm9, %v2382_v49, %v1042_v48  ;;  %v1054_v50 = vsel %vm1045_vm9, %v1042_v48, %v1044_v44  ;;  %v1313_v49 = vsel %vm2586_vm13, 4294967295, %v1817_v59  ;;  %vm1308_vm9 = vcmask 72704  }
 0x252   : > { %v1257_v53 = vsel %vm2584_vm7, %v1228_v38, %v1053_v26  ;;  %v1260_v8 = vsel %vm2585_vm11, %v1229_v58, %v1054_v50  ;;  %v1314_v57 = vsel %vm1312_vm12, %v1313_v49, 0 }
 0x253   : > { %1294 = vrot.lane.b32.xlu1 %v1257_v53, %s1816_s18  ;;  %1296 = vrot.lane.b32.xlu0 %v1260_v8, %s1816_s18 }
 0x257   : > { %1265 = vperm.xlu1 %1783, %v1262_v56  }
 0x285   : > { %v1279_v6 = vpop.permute.xlu1 %1278 }
 0x288   : > { %v1283_v51 = vpop.permute.xlu0 %1282 }
 0x289   : > { %v1281_v62 = vpop.permute.xlu1 %1280 }
 0x28a   : > { %v1299_v9 = vsel %vm1298_vm15, %v1279_v6, %v1281_v62  ;;  %v1300_v45 = vsel %vm1298_vm15, %v1281_v62, %v1283_v51 }
 0x28b   : > { %v1316_v13 = vand.u32 %v1314_v57, %v1299_v9  ;;  %v1319_v54 = vand.u32 %v1314_v57, %v1300_v45 }
 0x28c   : > { %v1285_v55 = vpop.permute.xlu0 %1284 }
 0x28d   : > { %1345 = vmatprep.subr.bf16.mxu1 %v1319_v54  ;;  %v1301_v63 = vsel %vm1298_vm15, %v1283_v51, %v1285_v55 }
 0x28e   : > { %1346 = vmatpush1.bf16.msra.mxu1 %v1316_v13  ;;  %v1322_v42 = vand.u32 %v1314_v57, %v1301_v63 }
 0x291   : > { %1654 = vmatmul.mubr.msk.bf16.vlgmr.msra.gmra.mrb[8].mxu1 %vm1308_vm9, %v1261_v21 }
 0x292   : > { %1459 = vmatprep.mubr.bf16.mxu1 %v1807_v1 }
 0x2a8   : > { %v1287_v15 = vpop.permute.xlu1 %1286  ;;  %v1289_v25 = vpop.permute.xlu0 %1288 }
 0x2a9   : > { %v1302_v19 = vsel %vm1298_vm15, %v1285_v55, %v1287_v15  ;;  %v1303_v60 = vsel %vm1298_vm15, %v1287_v15, %v1289_v25 }
 0x2aa   : > { %v1325_v22 = vand.u32 %v1314_v57, %v1302_v19  ;;  %v1328_v0 = vand.u32 %v1314_v57, %v1303_v60 }
 0x2ac   : > { %1386 = vmatprep.subr.bf16.mxu0 %v1325_v22 }
 0x2ad   : > { %1387 = vmatpush1.bf16.msra.mxu0 %v1322_v42 }
 0x2b0   : > { %1655 = vmatmul.mubr.msk.bf16.vlgmr.msra.gmra.mrb[12].mxu0 %vm1308_vm9, %v1261_v21 }
 0x2b1   : > { %1500 = vmatprep.mubr.bf16.mxu0 %v1807_v1 }
 0x2ba   : > { %v1291_v61 = vpop.permute.xlu1 %1290 }
 0x2bb   : > { %v1304_v28 = vsel %vm1298_vm15, %v1289_v25, %v1291_v61  ;;  %v1293_v10 = vpop.permute.xlu0 %1292 }
 0x2bc   : > { %v1331_v43 = vand.u32 %v1314_v57, %v1304_v28  ;;  %v1305_v7 = vsel %vm1298_vm15, %v1291_v61, %v1293_v10 }
 0x2bd   : > { %v1334_v24 = vand.u32 %v1314_v57, %v1305_v7 }
 0x2be   : > { %1427 = vmatprep.subr.bf16.mxu1 %v1331_v43 }
 0x2bf   : > { %1428 = vmatpush1.bf16.msra.mxu1 %v1328_v0 }
 0x2c2   : > { %1656 = vmatmul.mubr.msk.bf16.vlgmr.msra.gmra.mrb[12].mxu1 %vm1308_vm9, %v1261_v21 }
 0x2c3   : > { %1541 = vmatprep.mubr.bf16.mxu1 %v1807_v1 }
 0x2c5   : > { %v1295_v3 = vpop.permute.xlu1 %1294  ;;  %v1297_v2 = vpop.permute.xlu0 %1296 }
 0x2c6   : > { %v1306_v30 = vsel %vm1298_vm15, %v1293_v10, %v1295_v3  ;;  %v1307_v14 = vsel %vm1298_vm15, %v1295_v3, %v1297_v2  ;;  %v1343_v4 = vand.u32 %v1314_v57, %v1297_v2 }
 0x2c7   : > { %v1337_v23 = vand.u32 %v1314_v57, %v1306_v30  ;;  %v1340_v31 = vand.u32 %v1314_v57, %v1307_v14 }
 0x2c8   : > { %1509 = vmatprep.subr.bf16.mxu1 %v1343_v4 }
 0x2c9   : > { %1468 = vmatprep.subr.bf16.mxu0 %v1337_v23  ;;  %1510 = vmatpush1.bf16.msra.mxu1 %v1340_v31 }
 0x2ca   : > { %1469 = vmatpush1.bf16.msra.mxu0 %v1334_v24 }
 0x2cc   : > { %1658 = vmatmul.mubr.msk.bf16.vlgmr.msra.gmra.mrb[16].mxu1 %vm1308_vm9, %v1261_v21 }
 0x2cd   : > { %1657 = vmatmul.mubr.msk.bf16.vlgmr.msra.gmra.mrb[16].mxu0 %vm1308_vm9, %v1261_v21 }
 0x2d6   : > { %v1266_v1 = vpop.permute.xlu1 %1265 }
 0x364   : > { %v1379_v11 = vpop.f32.mrb[8].mxu1 }
 0x365   : > { %v1381_v35 = vpop.f32.mrb[9].mxu1  ;;  %v1380_v16 = vadd.f32 %v1379_v11, %v1266_v1 }
 0x366   : > { %v1383_v41 = vpop.f32.mrb[10].mxu1  ;;  %v1382_v5 = vadd.f32 %v1381_v35, %v1266_v1 }
 0x367   : > { %v1384_v27 = vpop.f32.mrb[11].mxu1 }
 0x368   : > { %v1560_v32 = vcombine.low %v1380_v16, %v1382_v5 }
 0x36a   : > { %1570 = vst [vmem:[%s2536_s27] sm:$0xff] %v1560_v32 }
 0x383   : > { %v1420_v52 = vpop.f32.mrb[12].mxu0 }
 0x384   : > { %v1421_v36 = vadd.f32 %v1420_v52, %v1266_v1  ;;  %v1422_v17 = vpop.f32.mrb[13].mxu0 }
 0x385   : > { %v1423_v12 = vadd.f32 %v1422_v17, %v1266_v1  ;;  %v1424_v29 = vpop.f32.mrb[14].mxu0 }
 0x386   : > { %v1425_v33 = vpop.f32.mrb[15].mxu0 }
 0x387   : > { %v1561_v47 = vcombine.low %v1421_v36, %v1423_v12 }
 0x389   : > { %1571 = vst [vmem:[%s2536_s27 + $0x8] sm:$0xff] %v1561_v47 }
 0x395   : > { %v1461_v18 = vpop.f32.mrb[12].mxu1 }
 0x396   : > { %v1462_v37 = vadd.f32 %v1461_v18, %v1266_v1  ;;  %v1463_v34 = vpop.f32.mrb[13].mxu1 }
 0x397   : > { %v1464_v20 = vadd.f32 %v1463_v34, %v1266_v1  ;;  %v1465_v39 = vpop.f32.mrb[14].mxu1 }
 0x398   : > { %v1466_v40 = vpop.f32.mrb[15].mxu1 }
 0x399   : > { %v1562_v46 = vcombine.low %v1462_v37, %v1464_v20 }
 0x39b   : > { %1572 = vst [vmem:[%s2536_s27 + $0x10] sm:$0xff] %v1562_v46 }
 0x39f   : > { %v1543_v48 = vpop.f32.mrb[16].mxu1 }
 0x3a0   : > { %v1502_v44 = vpop.f32.mrb[16].mxu0  ;;  %v1544_v38 = vadd.f32 %v1543_v48, %v1266_v1  ;;  %v1545_v58 = vpop.f32.mrb[17].mxu1 }
 0x3a1   : > { %v1503_v26 = vadd.f32 %v1502_v44, %v1266_v1  ;;  %v1504_v50 = vpop.f32.mrb[17].mxu0  ;;  %v1546_v53 = vadd.f32 %v1545_v58, %v1266_v1  ;;  %v1547_v8 = vpop.f32.mrb[18].mxu1 }
 0x3a2   : > { %v1505_v56 = vadd.f32 %v1504_v50, %v1266_v1  ;;  %v1506_v6 = vpop.f32.mrb[18].mxu0  ;;  %v1548_v59 = vpop.f32.mrb[19].mxu1 }
 0x3a3   : > { %v1564_v49 = vcombine.low %v1544_v38, %v1546_v53  ;;  %v1507_v51 = vpop.f32.mrb[19].mxu0 }
 0x3a4   : > { %v1563_v57 = vcombine.low %v1503_v26, %v1505_v56 }
 0x3a5   : > { %1576 = vst.msk [vmem:[%s2536_s27 + $0x20] sm:$0xff] %vm1575_vm5, %v1564_v49 }
 0x3a6   : > { %1573 = vst [vmem:[%s2536_s27 + $0x18] sm:$0xff] %v1563_v57 }
 0x3a7 PF: > { %s18_s23 = sadd.s32 1, %s1805_s23  }
 0x3a8   : > { %p15_p4 = scmp.ge.s32.totalorder %s18_s23, 4  }
 0x3aa   :  { %17 = sbr.rel (!%p15_p4) target bundleno = 3 (0x3), region = 74 }

</bundles_post_ra>
